<compile_context>
chip_gen: v5e
topology: v5e:2x2
jax: 0.10.0
libtpu: 0.0.40
codegen_flags: <defaults>
</compile_context>

<pallas_src>
import functools

import numpy as np
import jax
import jax.numpy as jnp
from jax import lax
from jax.experimental import pallas as pl
from jax.experimental.pallas import tpu as pltpu

_FAR = 1.0e6  # depth-buffer init value (torch: zeros + 1000000.)

# packed per-face coefficient columns
_NC = 22
(_XMIN, _XMAX, _YMIN, _YMAX,
 _A1, _B1, _C1, _A2, _B2, _C2, _A3, _B3, _C3,
 _UX, _UY, _UC, _VX, _VY, _VC,
 _R0, _DR1, _DR2) = range(_NC)


def _round_up(x, m):
    return (x + m - 1) // m * m


def _transform_vertices(vertices, h, w):
    """vertices[...,0]*w/2 + w/2, vertices[...,1]*h/2 + h/2, vertices[...,2]*w/2"""
    v = vertices.astype(jnp.float32)
    vx = v[..., 0] * w / 2 + w / 2
    vy = v[..., 1] * h / 2 + h / 2
    vz = v[..., 2] * w / 2
    return jnp.stack([vx, vy, vz], axis=-1)


def _precompute_face_coeffs(f_vs, h, w):
    """Hoisted per-face setup.  f_vs: (..., 3, 3) face-vertex screen coords.
    Returns (..., _NC) coefficients so the per-pixel work is purely affine:
      c_i = A_i*px + B_i*py + C_i      (edge sign tests, same signs as torch)
      u   = Ux*px + Uy*py + Uc
      v   = Vx*px + Vy*py + Vc         (get_point_weight barycentric maps)
      s   = r0 + u*(r2-r0) + v*(r1-r0) (perspective depth = 1/s)
    """
    f = f_vs.astype(jnp.float32)
    p0x, p0y, z0 = f[..., 0, 0], f[..., 0, 1], f[..., 0, 2]
    p1x, p1y, z1 = f[..., 1, 0], f[..., 1, 1], f[..., 1, 2]
    p2x, p2y, z2 = f[..., 2, 0], f[..., 2, 1], f[..., 2, 2]

    xmin = jnp.maximum(jnp.ceil(jnp.minimum(jnp.minimum(p0x, p1x), p2x)), 0.0)
    xmax = jnp.minimum(jnp.floor(jnp.maximum(jnp.maximum(p0x, p1x), p2x)), float(w - 1))
    ymin = jnp.maximum(jnp.ceil(jnp.minimum(jnp.minimum(p0y, p1y), p2y)), 0.0)
    ymax = jnp.minimum(jnp.floor(jnp.maximum(jnp.maximum(p0y, p1y), p2y)), float(h - 1))

    e1x, e1y = p1x - p0x, p1y - p0y
    e2x, e2y = p2x - p1x, p2y - p1y
    e3x, e3y = p0x - p2x, p0y - p2y
    a1, b1, c1 = -e1y, e1x, e1y * p0x - e1x * p0y
    a2, b2, c2 = -e2y, e2x, e2y * p1x - e2x * p1y
    a3, b3, c3 = -e3y, e3x, e3y * p2x - e3x * p2y

    v0x, v0y = p2x - p0x, p2y - p0y
    v1x, v1y = p1x - p0x, p1y - p0y
    dot00 = v0x * v0x + v0y * v0y
    dot01 = v0x * v1x + v0y * v1y
    dot11 = v1x * v1x + v1y * v1y
    denom = dot00 * dot11 - dot01 * dot01
    inv_denom = jnp.where(denom == 0.0, 0.0, 1.0 / denom)
    ux = inv_denom * (dot11 * v0x - dot01 * v1x)
    uy = inv_denom * (dot11 * v0y - dot01 * v1y)
    uc = -(ux * p0x + uy * p0y)
    vx = inv_denom * (dot00 * v1x - dot01 * v0x)
    vy = inv_denom * (dot00 * v1y - dot01 * v0y)
    vc = -(vx * p0x + vy * p0y)

    r0, r1, r2 = 1.0 / z0, 1.0 / z1, 1.0 / z2

    return jnp.stack([xmin, xmax, ymin, ymax,
                      a1, b1, c1, a2, b2, c2, a3, b3, c3,
                      ux, uy, uc, vx, vy, vc,
                      r0, r1 - r0, r2 - r0], axis=-1)


def _eval_face_pixel(C, px, py):
    """Per-(face, pixel) evaluation of the hoisted affine coefficients.
    C: (..., F, _NC); px/py broadcast to (..., F, P).  Returns inside, u, v, s."""
    def col(k):
        return C[..., k:k + 1]
    in_bbox = ((px >= col(_XMIN)) & (px <= col(_XMAX)) &
               (py >= col(_YMIN)) & (py <= col(_YMAX)))
    c1 = col(_A1) * px + col(_B1) * py + col(_C1)
    c2 = col(_A2) * px + col(_B2) * py + col(_C2)
    c3 = col(_A3) * px + col(_B3) * py + col(_C3)
    inside = in_bbox & (c1 * c2 >= 0.0) & (c2 * c3 >= 0.0)
    u = col(_UX) * px + col(_UY) * py + col(_UC)
    v = col(_VX) * px + col(_VY) * py + col(_VC)
    s = col(_R0) + u * col(_DR2) + v * col(_DR1)
    return inside, u, v, s


def _rasterize_kernel(ftb_ref, ptb_ref, pxpy_ref, coef_ref, attr_ref, out_ref,
                      zbuf_ref, acc_ref, *, D, TP, TF, n_ft):
    # ftb_ref : SMEM i32[bz*n_ft*4]   per (batch, face-tile) clamped screen bbox
    # ptb_ref : SMEM i32[n_pt*4]      per pixel-tile screen bbox
    # pxpy_ref: (2, TP)  f32          precomputed pixel x / y for this tile
    # coef_ref: (TF, _NC) f32         hoisted per-face affine coefficients
    # attr_ref: (D, 3*TF) f32         attrs, vertex-major per tile, faces on lanes
    # out_ref : (D+1, TP) f32         interpolated attributes + vismask
    b = pl.program_id(0)
    p = pl.program_id(1)
    f = pl.program_id(2)

    @pl.when(f == 0)
    def _():
        zbuf_ref[...] = jnp.full_like(zbuf_ref, _FAR)
        acc_ref[...] = jnp.zeros_like(acc_ref)

    # tile-level culling: face-tile bbox vs pixel-tile bbox (8 SMEM scalars)
    fbase = (b * n_ft + f) * 4
    pbase = p * 4
    overlap = ((ftb_ref[fbase + 0] <= ptb_ref[pbase + 1]) &
               (ftb_ref[fbase + 1] >= ptb_ref[pbase + 0]) &
               (ftb_ref[fbase + 2] <= ptb_ref[pbase + 3]) &
               (ftb_ref[fbase + 3] >= ptb_ref[pbase + 2]))

    @pl.when(overlap)
    def _():
        C = coef_ref[...]                               # (TF, _NC)
        px = pxpy_ref[0:1, :]                           # (1, TP)
        py = pxpy_ref[1:2, :]

        inside, u, v, s = _eval_face_pixel(C, px, py)   # (TF, TP)

        # perspective-correct depth; approx reciprocal -> EUP slot, off the VALU
        zp = pl.reciprocal(s, approx=True)
        masked_z = jnp.where(inside, zp, _FAR)
        tile_best = jnp.min(masked_z, axis=0, keepdims=True)           # (1, TP)

        # winner = largest in-tile face index attaining the tile-minimum depth.
        # TODO(synk): the CUDA kernel resolves equal-depth faces via atomicMin
        # races; here ties resolve deterministically to the largest face index.
        fidx = lax.broadcasted_iota(jnp.int32, (TF, 1), 0)
        win = inside & (masked_z == tile_best)
        winner = jnp.max(jnp.where(win, fidx, -1), axis=0, keepdims=True)
        sel = fidx == winner                                           # (TF, TP)

        # winner-masked barycentric weights, stacked per-vertex on sublanes so
        # gather + interpolation fuse into ONE lane-dense MXU matmul.
        wgt = jnp.concatenate(
            [jnp.where(sel, 1.0 - u - v, 0.0),
             jnp.where(sel, v, 0.0),
             jnp.where(sel, u, 0.0)], axis=0)                          # (3*TF, TP)
        pix = jnp.dot(attr_ref[...], wgt, preferred_element_type=jnp.float32)

        # carried z-buffer select across face tiles; '<=' keeps the largest-index
        # winner among exactly-equal depths (matches the reference tie-break).
        replace = (tile_best < _FAR) & (tile_best <= zbuf_ref[...])    # (1, TP)
        acc_ref[...] = jnp.where(replace, pix, acc_ref[...])
        zbuf_ref[...] = jnp.where(replace, tile_best, zbuf_ref[...])

    @pl.when(f == pl.num_programs(2) - 1)
    def _():
        vis = (zbuf_ref[...] < _FAR).astype(jnp.float32)               # (1, TP)
        out_ref[...] = jnp.concatenate([acc_ref[...], vis], axis=0)    # one store


def _default_tiles():
    """Chip-gated tile sizes / VMEM limit (review: grow tiles on 128 MiB chips,
    cap the TFxTP product on v7x's 64 MiB)."""
    try:
        cap = pltpu.get_tpu_info().vmem_capacity_bytes
    except Exception:
        return 512, 256, None               # conservative fallback
    if cap >= 100 * 1024 * 1024:            # v5e / v6e (128 MiB)
        return 1024, 256, 64 * 1024 * 1024
    return 1024, 256, None                  # v7x (64 MiB): keep default scoped limit


def standard_rasterizer_forward(vertices, faces, attributes, height, width=None,
                                *, pixel_tile=None, face_tile=None):
    """vertices (bz,nv,3) f32, faces (bz,nf,3) i32, attributes (bz,nf,3,D) f32
    -> (bz, D+1, h, w) f32 (interpolated attributes + vismask), NCHW."""
    if width is None:
        width = height
    h, w = int(height), int(width)
    bz = vertices.shape[0]
    nf = faces.shape[1]
    D = attributes.shape[-1]
    P = h * w

    d_tp, d_tf, vmem_limit = _default_tiles()
    pixel_tile = d_tp if pixel_tile is None else int(pixel_tile)
    face_tile = d_tf if face_tile is None else int(face_tile)

    TP = _round_up(min(pixel_tile, _round_up(P, 128)), 128)
    P_pad = _round_up(P, TP)
    if nf <= face_tile:
        TF = _round_up(nf, 8)              # single face tile; dims == full array
        nf_pad = TF
    else:
        TF = _round_up(face_tile, 128)     # 3*TF must tile the fused attr lane dim
        nf_pad = _round_up(nf, TF)
    n_ft = nf_pad // TF
    n_pt = P_pad // TP

    # ---- hoisted per-face setup ------------------------------------------------
    verts = _transform_vertices(vertices, h, w)
    # util.face_vertices: per-batch gather of face vertex coords -> (bz, nf, 3, 3)
    # TODO(synk): torch gathers attributes.view(bz*nf,3,D) with the raw triangle-
    # buffer index; we use the per-batch-correct gather (equivalent result).
    f_vs = jax.vmap(lambda v, f: v[f])(verts, faces)
    attrs_p = attributes.astype(jnp.float32)
    if nf_pad > nf:
        # degenerate off-screen pad faces: empty bbox -> never rasterized
        pad_face = jnp.full((3, 3), -10.0, jnp.float32).at[:, 2].set(1.0)
        f_vs = jnp.concatenate(
            [f_vs, jnp.broadcast_to(pad_face, (bz, nf_pad - nf, 3, 3))], axis=1)
        attrs_p = jnp.pad(attrs_p, ((0, 0), (0, nf_pad - nf), (0, 0), (0, 0)))

    coefs = _precompute_face_coeffs(f_vs, h, w)                 # (bz, nf_pad, _NC)

    # fused attribute layout: (bz, D, n_ft * 3 * TF), vertex-major within a tile
    attr_t = (attrs_p.reshape(bz, n_ft, TF, 3, D)
              .transpose(0, 4, 1, 3, 2)
              .reshape(bz, D, n_ft * 3 * TF))

    # ---- precomputed pixel coordinates + tile bounding boxes (static) -----------
    pid = np.arange(P_pad, dtype=np.int64)
    valid_pix = pid < P
    pxi = np.where(valid_pix, pid % w, -1).astype(np.int32)
    pyi = np.where(valid_pix, pid // w, -1).astype(np.int32)
    pxpy = jnp.asarray(np.stack([pxi, pyi], axis=0), jnp.float32)      # (2, P_pad)

    big = np.int32(10 ** 9)
    pxr, pyr, vr = pxi.reshape(n_pt, TP), pyi.reshape(n_pt, TP), valid_pix.reshape(n_pt, TP)
    pt_bbox = np.stack([np.where(vr, pxr, big).min(1), np.where(vr, pxr, -big).max(1),
                        np.where(vr, pyr, big).min(1), np.where(vr, pyr, -big).max(1)],
                       axis=1).astype(np.int32).reshape(-1)            # (n_pt*4,)
    pt_bbox = jnp.asarray(pt_bbox)

    # per-(batch, face-tile) bbox = union of valid per-face bboxes
    fx0, fx1 = coefs[..., _XMIN], coefs[..., _XMAX]
    fy0, fy1 = coefs[..., _YMIN], coefs[..., _YMAX]
    valid_face = (fx0 <= fx1) & (fy0 <= fy1)
    def _tile_red(x, fill, red):
        return red(jnp.where(valid_face, x, fill).reshape(bz, n_ft, TF), axis=2)
    ft_bbox = jnp.stack([_tile_red(fx0, 1e9, jnp.min), _tile_red(fx1, -1e9, jnp.max),
                         _tile_red(fy0, 1e9, jnp.min), _tile_red(fy1, -1e9, jnp.max)],
                        axis=-1).astype(jnp.int32).reshape(-1)         # (bz*n_ft*4,)

    # ---- pallas call -------------------------------------------------------------
    kernel = functools.partial(_rasterize_kernel, D=D, TP=TP, TF=TF, n_ft=n_ft)
    cost = pl.CostEstimate(
        flops=int(bz * P_pad * nf_pad * (30 + 6 * D)),
        transcendentals=int(bz * P_pad * nf_pad),
        bytes_accessed=int(4 * (bz * n_pt * (nf_pad * _NC + D * 3 * nf_pad)
                                + 2 * P_pad + bz * (D + 1) * P_pad)),
    )

    grid_spec = pltpu.PrefetchScalarGridSpec(
        num_scalar_prefetch=2,
        grid=(bz, n_pt, n_ft),
        in_specs=[
            pl.BlockSpec((2, TP), lambda b, p, f, ftb, ptb: (0, p)),
            pl.BlockSpec((None, TF, _NC), lambda b, p, f, ftb, ptb: (b, f, 0)),
            pl.BlockSpec((None, D, 3 * TF), lambda b, p, f, ftb, ptb: (b, 0, f)),
        ],
        out_specs=pl.BlockSpec((None, D + 1, TP), lambda b, p, f, ftb, ptb: (b, 0, p)),
        scratch_shapes=[
            pltpu.VMEM((1, TP), jnp.float32),   # carried z-buffer
            pltpu.VMEM((D, TP), jnp.float32),   # carried interpolated attributes
        ],
    )

    out = pl.pallas_call(
        kernel,
        out_shape=jax.ShapeDtypeStruct((bz, D + 1, P_pad), jnp.float32),
        grid_spec=grid_spec,
        compiler_params=pltpu.CompilerParams(
            dimension_semantics=("parallel", "parallel", "arbitrary"),
            vmem_limit_bytes=vmem_limit),
        cost_estimate=cost,
    )(ft_bbox, pt_bbox, pxpy, coefs, attr_t)

    # (bz, D+1, P) with pixels row-major -> free reshape to NCHW, no transpose.
    return out[:, :, :P].reshape(bz, D + 1, h, w)


def reference_forward(vertices, faces, attributes, height, width=None):
    """Pure-JAX reference (same math, no Pallas) for a correctness check."""
    if width is None:
        width = height
    h, w = int(height), int(width)
    bz = vertices.shape[0]
    nf = faces.shape[1]
    D = attributes.shape[-1]
    P = h * w

    verts = _transform_vertices(vertices, h, w)
    f_vs = jax.vmap(lambda v, f: v[f])(verts, faces)               # (bz, nf, 3, 3)
    coefs = _precompute_face_coeffs(f_vs, h, w)                    # (bz, nf, _NC)

    pid = jnp.arange(P, dtype=jnp.int32)[None, None, :]            # (1, 1, P)
    px = (pid % w).astype(jnp.float32)
    py = (pid // w).astype(jnp.float32)

    inside, u, v, s = _eval_face_pixel(coefs, px, py)              # (bz, nf, P)
    zp = 1.0 / s
    masked_z = jnp.where(inside, zp, _FAR)
    best = jnp.min(masked_z, axis=1, keepdims=True)                # (bz, 1, P)
    fidx = jnp.arange(nf, dtype=jnp.int32)[None, :, None]
    win = inside & (masked_z == best)
    winner = jnp.max(jnp.where(win, fidx, -1), axis=1)             # (bz, P)
    vis = best[:, 0, :] < _FAR
    safe = jnp.where(winner >= 0, winner, 0)                       # torch: pix_to_face[mask]=0
    sel = fidx == winner[:, None, :]
    b0 = jnp.sum(jnp.where(sel, 1.0 - u - v, 0.0), axis=1)
    b1 = jnp.sum(jnp.where(sel, v, 0.0), axis=1)
    b2 = jnp.sum(jnp.where(sel, u, 0.0), axis=1)

    pfv = jax.vmap(lambda a, i: a[i])(attributes.astype(jnp.float32), safe)  # (bz,P,3,D)
    pix = (b0[..., None] * pfv[:, :, 0, :]
           + b1[..., None] * pfv[:, :, 1, :]
           + b2[..., None] * pfv[:, :, 2, :])
    pix = jnp.where(vis[..., None], pix, 0.0)                      # torch: pixel_vals[mask]=0
    pix = jnp.transpose(pix, (0, 2, 1)).reshape(bz, D, h, w)
    vism = vis.astype(jnp.float32).reshape(bz, 1, h, w)
    return jnp.concatenate([pix, vism], axis=1)                    # (bz, D+1, h, w)


if __name__ == "__main__":
    # Well-conditioned deterministic test geometry: a jittered triangulated grid
    # with positive, distinct depths.
    h = w = 16
    bz, D, gv = 2, 3, 5
    nv = gv * gv

    key = jax.random.PRNGKey(0)
    kxy, kz, ka = jax.random.split(key, 3)

    xs = jnp.linspace(-0.85, 0.85, gv)
    gx, gy = jnp.meshgrid(xs, xs, indexing="xy")
    base_xy = jnp.stack([gx.ravel(), gy.ravel()], axis=-1)            # (nv, 2)
    xy = base_xy[None, :, :] + 0.04 * jax.random.normal(kxy, (bz, nv, 2))
    z = jax.random.uniform(kz, (bz, nv, 1), minval=0.25, maxval=0.9)
    vertices = jnp.concatenate([xy, z], axis=-1).astype(jnp.float32)  # (bz, nv, 3)

    quads = []
    for i in range(gv - 1):
        for j in range(gv - 1):
            v00 = i * gv + j
            quads.append([v00, v00 + 1, v00 + gv])
            quads.append([v00 + gv + 1, v00 + gv, v00 + 1])
    faces = jnp.tile(jnp.asarray(quads, jnp.int32)[None], (bz, 1, 1))  # (bz, 32, 3)

    attributes = jax.random.normal(ka, (bz, faces.shape[1], 3, D), jnp.float32)

    fwd = jax.jit(lambda v, f, a: standard_rasterizer_forward(v, f, a, h))
    out = jax.block_until_ready(fwd(vertices, faces, attributes))

    ref = jax.block_until_ready(reference_forward(vertices, faces, attributes, h))

    assert out.shape == (bz, D + 1, h, w) and out.dtype == jnp.float32
    np.testing.assert_allclose(np.asarray(out), np.asarray(ref), rtol=1e-4, atol=1e-4)
    print("KERNEL_OK")
</pallas_src>

<mosaic_0001>
module attributes {stable_mosaic.version = 11 : i64} {
  func.func @_rasterize_kernel(%arg0: i32, %arg1: i32, %arg2: i32, %arg3: memref<8xi32, #tpu.memory_space<smem>>, %arg4: memref<4xi32, #tpu.memory_space<smem>>, %arg5: memref<2x256xf32, #tpu.memory_space<vmem>>, %arg6: memref<1x32x22xf32, #tpu.memory_space<vmem>>, %arg7: memref<1x3x96xf32, #tpu.memory_space<vmem>>, %arg8: memref<1x4x256xf32, #tpu.memory_space<vmem>>, %arg9: memref<1x256xf32, #tpu.memory_space<vmem>>, %arg10: memref<3x256xf32, #tpu.memory_space<vmem>>) attributes {dimension_semantics = [#tpu.dimension_semantics<parallel>, #tpu.dimension_semantics<parallel>, #tpu.dimension_semantics<arbitrary>], iteration_bounds = array<i64: 2, 1, 1>, scalar_prefetch = 2 : i64, scratch_operands = 2 : i64, tpu.core_type = #tpu.core_type<tc>, window_params = [{transform_indices = @transform_0, window_bounds = array<i64: 2, 256>}, {transform_indices = @transform_1, window_bounds = array<i64: 1, 32, 22>}, {transform_indices = @transform_2, window_bounds = array<i64: 1, 3, 96>}, {transform_indices = @transform_3, window_bounds = array<i64: 1, 4, 256>}]} {
    %c0_i32 = arith.constant 0 : i32
    %0 = arith.cmpi eq, %arg2, %c0_i32 : i32
    %1 = arith.extui %0 : i1 to i32
    %c0_i32_0 = arith.constant 0 : i32
    %2 = arith.cmpi ne, %1, %c0_i32_0 : i32
    scf.if %2 {
      %cst = arith.constant 1.000000e+06 : f32
      %43 = vector.broadcast %cst : f32 to vector<1x256xf32>
      %c0 = arith.constant 0 : index
      %c0_11 = arith.constant 0 : index
      %44 = vector.load %arg9[%c0, %c0_11] : memref<1x256xf32, #tpu.memory_space<vmem>>, vector<1x256xf32>
      tpu.vector_store %arg9[%c0, %c0_11], %43 {strides = array<i32>} : memref<1x256xf32, #tpu.memory_space<vmem>>, vector<1x256xf32>,
      %cst_12 = arith.constant 0.000000e+00 : f32
      %45 = vector.broadcast %cst_12 : f32 to vector<3x256xf32>
      %c0_13 = arith.constant 0 : index
      %c0_14 = arith.constant 0 : index
      %46 = vector.load %arg10[%c0_13, %c0_14] : memref<3x256xf32, #tpu.memory_space<vmem>>, vector<3x256xf32>
      tpu.vector_store %arg10[%c0_13, %c0_14], %45 {strides = array<i32>} : memref<3x256xf32, #tpu.memory_space<vmem>>, vector<3x256xf32>,
    } else {
    }
    %c1_i32 = arith.constant 1 : i32
    %3 = arith.muli %arg0, %c1_i32 : i32
    %4 = arith.addi %3, %arg2 : i32
    %c4_i32 = arith.constant 4 : i32
    %5 = arith.muli %4, %c4_i32 : i32
    %c4_i32_1 = arith.constant 4 : i32
    %6 = arith.muli %arg1, %c4_i32_1 : i32
    %c0_i32_2 = arith.constant 0 : i32
    %7 = arith.addi %5, %c0_i32_2 : i32
    %8 = arith.index_cast %7 : i32 to index
    %9 = memref.load %arg3[%8] : memref<8xi32, #tpu.memory_space<smem>>
    %c1_i32_3 = arith.constant 1 : i32
    %10 = arith.addi %6, %c1_i32_3 : i32
    %11 = arith.index_cast %10 : i32 to index
    %12 = memref.load %arg4[%11] : memref<4xi32, #tpu.memory_space<smem>>
    %13 = arith.cmpi sle, %9, %12 : i32
    %c1_i32_4 = arith.constant 1 : i32
    %14 = arith.addi %5, %c1_i32_4 : i32
    %15 = arith.index_cast %14 : i32 to index
    %16 = memref.load %arg3[%15] : memref<8xi32, #tpu.memory_space<smem>>
    %c0_i32_5 = arith.constant 0 : i32
    %17 = arith.addi %6, %c0_i32_5 : i32
    %18 = arith.index_cast %17 : i32 to index
    %19 = memref.load %arg4[%18] : memref<4xi32, #tpu.memory_space<smem>>
    %20 = arith.cmpi sge, %16, %19 : i32
    %21 = arith.andi %13, %20 : i1
    %c2_i32 = arith.constant 2 : i32
    %22 = arith.addi %5, %c2_i32 : i32
    %23 = arith.index_cast %22 : i32 to index
    %24 = memref.load %arg3[%23] : memref<8xi32, #tpu.memory_space<smem>>
    %c3_i32 = arith.constant 3 : i32
    %25 = arith.addi %6, %c3_i32 : i32
    %26 = arith.index_cast %25 : i32 to index
    %27 = memref.load %arg4[%26] : memref<4xi32, #tpu.memory_space<smem>>
    %28 = arith.cmpi sle, %24, %27 : i32
    %29 = arith.andi %21, %28 : i1
    %c3_i32_6 = arith.constant 3 : i32
    %30 = arith.addi %5, %c3_i32_6 : i32
    %31 = arith.index_cast %30 : i32 to index
    %32 = memref.load %arg3[%31] : memref<8xi32, #tpu.memory_space<smem>>
    %c2_i32_7 = arith.constant 2 : i32
    %33 = arith.addi %6, %c2_i32_7 : i32
    %34 = arith.index_cast %33 : i32 to index
    %35 = memref.load %arg4[%34] : memref<4xi32, #tpu.memory_space<smem>>
    %36 = arith.cmpi sge, %32, %35 : i32
    %37 = arith.andi %29, %36 : i1
    %38 = arith.extui %37 : i1 to i32
    %c0_i32_8 = arith.constant 0 : i32
    %39 = arith.cmpi ne, %38, %c0_i32_8 : i32
    scf.if %39 {
      %c0 = arith.constant 0 : index
      %c0_11 = arith.constant 0 : index
      %c0_12 = arith.constant 0 : index
      %43 = vector.load %arg6[%c0, %c0_11, %c0_12] : memref<1x32x22xf32, #tpu.memory_space<vmem>>, vector<1x32x22xf32>
      %44 = vector.shape_cast %43 : vector<1x32x22xf32> to vector<32x22xf32>
      %c0_13 = arith.constant 0 : index
      %c0_14 = arith.constant 0 : index
      %45 = vector.load %arg5[%c0_13, %c0_14] : memref<2x256xf32, #tpu.memory_space<vmem>>, vector<1x256xf32>
      %c1 = arith.constant 1 : index
      %c0_15 = arith.constant 0 : index
      %46 = vector.load %arg5[%c1, %c0_15] : memref<2x256xf32, #tpu.memory_space<vmem>>, vector<1x256xf32>
      %47 = vector.extract_strided_slice %44 {offsets = [0, 0], sizes = [32, 1], strides = [1, 1]} : vector<32x22xf32> to vector<32x1xf32>
      %48 = vector.broadcast %45 : vector<1x256xf32> to vector<32x256xf32>
      %49 = vector.broadcast %47 : vector<32x1xf32> to vector<32x256xf32>
      %50 = arith.cmpf oge, %48, %49 : vector<32x256xf32>
      %51 = vector.extract_strided_slice %44 {offsets = [0, 1], sizes = [32, 1], strides = [1, 1]} : vector<32x22xf32> to vector<32x1xf32>
      %52 = vector.broadcast %45 : vector<1x256xf32> to vector<32x256xf32>
      %53 = vector.broadcast %51 : vector<32x1xf32> to vector<32x256xf32>
      %54 = arith.cmpf ole, %52, %53 : vector<32x256xf32>
      %55 = arith.andi %50, %54 : vector<32x256xi1>
      %56 = vector.extract_strided_slice %44 {offsets = [0, 2], sizes = [32, 1], strides = [1, 1]} : vector<32x22xf32> to vector<32x1xf32>
      %57 = vector.broadcast %46 : vector<1x256xf32> to vector<32x256xf32>
      %58 = vector.broadcast %56 : vector<32x1xf32> to vector<32x256xf32>
      %59 = arith.cmpf oge, %57, %58 : vector<32x256xf32>
      %60 = arith.andi %55, %59 : vector<32x256xi1>
      %61 = vector.extract_strided_slice %44 {offsets = [0, 3], sizes = [32, 1], strides = [1, 1]} : vector<32x22xf32> to vector<32x1xf32>
      %62 = vector.broadcast %46 : vector<1x256xf32> to vector<32x256xf32>
      %63 = vector.broadcast %61 : vector<32x1xf32> to vector<32x256xf32>
      %64 = arith.cmpf ole, %62, %63 : vector<32x256xf32>
      %65 = arith.andi %60, %64 : vector<32x256xi1>
      %66 = vector.extract_strided_slice %44 {offsets = [0, 4], sizes = [32, 1], strides = [1, 1]} : vector<32x22xf32> to vector<32x1xf32>
      %67 = vector.broadcast %66 : vector<32x1xf32> to vector<32x256xf32>
      %68 = vector.broadcast %45 : vector<1x256xf32> to vector<32x256xf32>
      %69 = arith.mulf %67, %68 : vector<32x256xf32>
      %70 = vector.extract_strided_slice %44 {offsets = [0, 5], sizes = [32, 1], strides = [1, 1]} : vector<32x22xf32> to vector<32x1xf32>
      %71 = vector.broadcast %70 : vector<32x1xf32> to vector<32x256xf32>
      %72 = vector.broadcast %46 : vector<1x256xf32> to vector<32x256xf32>
      %73 = arith.mulf %71, %72 : vector<32x256xf32>
      %74 = arith.addf %69, %73 : vector<32x256xf32>
      %75 = vector.extract_strided_slice %44 {offsets = [0, 6], sizes = [32, 1], strides = [1, 1]} : vector<32x22xf32> to vector<32x1xf32>
      %76 = vector.broadcast %75 : vector<32x1xf32> to vector<32x256xf32>
      %77 = arith.addf %74, %76 : vector<32x256xf32>
      %78 = vector.extract_strided_slice %44 {offsets = [0, 7], sizes = [32, 1], strides = [1, 1]} : vector<32x22xf32> to vector<32x1xf32>
      %79 = vector.broadcast %78 : vector<32x1xf32> to vector<32x256xf32>
      %80 = vector.broadcast %45 : vector<1x256xf32> to vector<32x256xf32>
      %81 = arith.mulf %79, %80 : vector<32x256xf32>
      %82 = vector.extract_strided_slice %44 {offsets = [0, 8], sizes = [32, 1], strides = [1, 1]} : vector<32x22xf32> to vector<32x1xf32>
      %83 = vector.broadcast %82 : vector<32x1xf32> to vector<32x256xf32>
      %84 = vector.broadcast %46 : vector<1x256xf32> to vector<32x256xf32>
      %85 = arith.mulf %83, %84 : vector<32x256xf32>
      %86 = arith.addf %81, %85 : vector<32x256xf32>
      %87 = vector.extract_strided_slice %44 {offsets = [0, 9], sizes = [32, 1], strides = [1, 1]} : vector<32x22xf32> to vector<32x1xf32>
      %88 = vector.broadcast %87 : vector<32x1xf32> to vector<32x256xf32>
      %89 = arith.addf %86, %88 : vector<32x256xf32>
      %90 = vector.extract_strided_slice %44 {offsets = [0, 10], sizes = [32, 1], strides = [1, 1]} : vector<32x22xf32> to vector<32x1xf32>
      %91 = vector.broadcast %90 : vector<32x1xf32> to vector<32x256xf32>
      %92 = vector.broadcast %45 : vector<1x256xf32> to vector<32x256xf32>
      %93 = arith.mulf %91, %92 : vector<32x256xf32>
      %94 = vector.extract_strided_slice %44 {offsets = [0, 11], sizes = [32, 1], strides = [1, 1]} : vector<32x22xf32> to vector<32x1xf32>
      %95 = vector.broadcast %94 : vector<32x1xf32> to vector<32x256xf32>
      %96 = vector.broadcast %46 : vector<1x256xf32> to vector<32x256xf32>
      %97 = arith.mulf %95, %96 : vector<32x256xf32>
      %98 = arith.addf %93, %97 : vector<32x256xf32>
      %99 = vector.extract_strided_slice %44 {offsets = [0, 12], sizes = [32, 1], strides = [1, 1]} : vector<32x22xf32> to vector<32x1xf32>
      %100 = vector.broadcast %99 : vector<32x1xf32> to vector<32x256xf32>
      %101 = arith.addf %98, %100 : vector<32x256xf32>
      %102 = arith.mulf %77, %89 : vector<32x256xf32>
      %cst = arith.constant 0.000000e+00 : f32
      %103 = vector.broadcast %cst : f32 to vector<32x256xf32>
      %104 = arith.cmpf oge, %102, %103 : vector<32x256xf32>
      %105 = arith.andi %65, %104 : vector<32x256xi1>
      %106 = arith.mulf %89, %101 : vector<32x256xf32>
      %cst_16 = arith.constant 0.000000e+00 : f32
      %107 = vector.broadcast %cst_16 : f32 to vector<32x256xf32>
      %108 = arith.cmpf oge, %106, %107 : vector<32x256xf32>
      %109 = arith.andi %105, %108 : vector<32x256xi1>
      %110 = vector.extract_strided_slice %44 {offsets = [0, 13], sizes = [32, 1], strides = [1, 1]} : vector<32x22xf32> to vector<32x1xf32>
      %111 = vector.broadcast %110 : vector<32x1xf32> to vector<32x256xf32>
      %112 = vector.broadcast %45 : vector<1x256xf32> to vector<32x256xf32>
      %113 = arith.mulf %111, %112 : vector<32x256xf32>
      %114 = vector.extract_strided_slice %44 {offsets = [0, 14], sizes = [32, 1], strides = [1, 1]} : vector<32x22xf32> to vector<32x1xf32>
      %115 = vector.broadcast %114 : vector<32x1xf32> to vector<32x256xf32>
      %116 = vector.broadcast %46 : vector<1x256xf32> to vector<32x256xf32>
      %117 = arith.mulf %115, %116 : vector<32x256xf32>
      %118 = arith.addf %113, %117 : vector<32x256xf32>
      %119 = vector.extract_strided_slice %44 {offsets = [0, 15], sizes = [32, 1], strides = [1, 1]} : vector<32x22xf32> to vector<32x1xf32>
      %120 = vector.broadcast %119 : vector<32x1xf32> to vector<32x256xf32>
      %121 = arith.addf %118, %120 : vector<32x256xf32>
      %122 = vector.extract_strided_slice %44 {offsets = [0, 16], sizes = [32, 1], strides = [1, 1]} : vector<32x22xf32> to vector<32x1xf32>
      %123 = vector.broadcast %122 : vector<32x1xf32> to vector<32x256xf32>
      %124 = vector.broadcast %45 : vector<1x256xf32> to vector<32x256xf32>
      %125 = arith.mulf %123, %124 : vector<32x256xf32>
      %126 = vector.extract_strided_slice %44 {offsets = [0, 17], sizes = [32, 1], strides = [1, 1]} : vector<32x22xf32> to vector<32x1xf32>
      %127 = vector.broadcast %126 : vector<32x1xf32> to vector<32x256xf32>
      %128 = vector.broadcast %46 : vector<1x256xf32> to vector<32x256xf32>
      %129 = arith.mulf %127, %128 : vector<32x256xf32>
      %130 = arith.addf %125, %129 : vector<32x256xf32>
      %131 = vector.extract_strided_slice %44 {offsets = [0, 18], sizes = [32, 1], strides = [1, 1]} : vector<32x22xf32> to vector<32x1xf32>
      %132 = vector.broadcast %131 : vector<32x1xf32> to vector<32x256xf32>
      %133 = arith.addf %130, %132 : vector<32x256xf32>
      %134 = vector.extract_strided_slice %44 {offsets = [0, 19], sizes = [32, 1], strides = [1, 1]} : vector<32x22xf32> to vector<32x1xf32>
      %135 = vector.extract_strided_slice %44 {offsets = [0, 21], sizes = [32, 1], strides = [1, 1]} : vector<32x22xf32> to vector<32x1xf32>
      %136 = vector.broadcast %135 : vector<32x1xf32> to vector<32x256xf32>
      %137 = arith.mulf %121, %136 : vector<32x256xf32>
      %138 = vector.broadcast %134 : vector<32x1xf32> to vector<32x256xf32>
      %139 = arith.addf %138, %137 : vector<32x256xf32>
      %140 = vector.extract_strided_slice %44 {offsets = [0, 20], sizes = [32, 1], strides = [1, 1]} : vector<32x22xf32> to vector<32x1xf32>
      %141 = vector.broadcast %140 : vector<32x1xf32> to vector<32x256xf32>
      %142 = arith.mulf %133, %141 : vector<32x256xf32>
      %143 = arith.addf %139, %142 : vector<32x256xf32>
      %144 = tpu.reciprocal %143 {approx = true} : vector<32x256xf32> -> vector<32x256xf32>
      %cst_17 = arith.constant 1.000000e+06 : f32
      %145 = vector.broadcast %cst_17 : f32 to vector<32x256xf32>
      %146 = arith.select %109, %144, %145 : vector<32x256xi1>, vector<32x256xf32>
      %cst_18 = arith.constant dense<0x7F800000> : vector<256xf32>
      %147 = vector.multi_reduction <minimumf>, %146, %cst_18 [0] : vector<32x256xf32> to vector<256xf32>
      %148 = vector.shape_cast %147 : vector<256xf32> to vector<1x256xf32>
      %149 = tpu.iota {dimensions = array<i32: 0>} : vector<32x1xi32>
      %150 = vector.broadcast %148 : vector<1x256xf32> to vector<32x256xf32>
      %151 = arith.cmpf oeq, %146, %150 : vector<32x256xf32>
      %152 = arith.andi %109, %151 : vector<32x256xi1>
      %c-1_i32 = arith.constant -1 : i32
      %153 = vector.shape_cast %149 : vector<32x1xi32> to vector<32x1xi32>
      %154 = vector.broadcast %153 : vector<32x1xi32> to vector<32x256xi32>
      %155 = vector.broadcast %c-1_i32 : i32 to vector<32x256xi32>
      %156 = arith.select %152, %154, %155 : vector<32x256xi1>, vector<32x256xi32>
      %cst_19 = arith.constant dense<-2147483648> : vector<256xi32>
      %157 = vector.multi_reduction <maxsi>, %156, %cst_19 [0] : vector<32x256xi32> to vector<256xi32>
      %158 = vector.shape_cast %157 : vector<256xi32> to vector<1x256xi32>
      %159 = vector.broadcast %149 : vector<32x1xi32> to vector<32x256xi32>
      %160 = vector.broadcast %158 : vector<1x256xi32> to vector<32x256xi32>
      %161 = arith.cmpi eq, %159, %160 : vector<32x256xi32>
      %cst_20 = arith.constant 1.000000e+00 : f32
      %162 = vector.broadcast %cst_20 : f32 to vector<32x256xf32>
      %163 = arith.subf %162, %121 : vector<32x256xf32>
      %164 = arith.subf %163, %133 : vector<32x256xf32>
      %cst_21 = arith.constant 0.000000e+00 : f32
      %165 = vector.broadcast %cst_21 : f32 to vector<32x256xf32>
      %166 = arith.select %161, %164, %165 : vector<32x256xi1>, vector<32x256xf32>
      %cst_22 = arith.constant 0.000000e+00 : f32
      %167 = vector.broadcast %cst_22 : f32 to vector<32x256xf32>
      %168 = arith.select %161, %133, %167 : vector<32x256xi1>, vector<32x256xf32>
      %cst_23 = arith.constant 0.000000e+00 : f32
      %169 = vector.broadcast %cst_23 : f32 to vector<32x256xf32>
      %170 = arith.select %161, %121, %169 : vector<32x256xi1>, vector<32x256xf32>
      %171 = tpu.concatenate %166, %168, %170 in 0 : vector<32x256xf32>, vector<32x256xf32>, vector<32x256xf32> -> vector<96x256xf32>
      %c0_24 = arith.constant 0 : index
      %c0_25 = arith.constant 0 : index
      %c0_26 = arith.constant 0 : index
      %172 = vector.load %arg7[%c0_24, %c0_25, %c0_26] : memref<1x3x96xf32, #tpu.memory_space<vmem>>, vector<1x3x96xf32>
      %173 = vector.shape_cast %172 : vector<1x3x96xf32> to vector<3x96xf32>
      %cst_27 = arith.constant dense<0.000000e+00> : vector<3x256xf32>
      %174 = tpu.matmul %173, %171, %cst_27 {dimension_numbers = #tpu.dot_dimension_numbers<[1], [0], [0], [1], [0, 0, 1, 1], [], []>} : vector<3x96xf32>, vector<96x256xf32>, vector<3x256xf32> -> vector<3x256xf32>
      %cst_28 = arith.constant 1.000000e+06 : f32
      %175 = vector.broadcast %cst_28 : f32 to vector<1x256xf32>
      %176 = arith.cmpf olt, %148, %175 : vector<1x256xf32>
      %c0_29 = arith.constant 0 : index
      %c0_30 = arith.constant 0 : index
      %177 = vector.load %arg9[%c0_29, %c0_30] : memref<1x256xf32, #tpu.memory_space<vmem>>, vector<1x256xf32>
      %178 = arith.cmpf ole, %148, %177 : vector<1x256xf32>
      %179 = arith.andi %176, %178 : vector<1x256xi1>
      %c0_31 = arith.constant 0 : index
      %c0_32 = arith.constant 0 : index
      %180 = vector.load %arg10[%c0_31, %c0_32] : memref<3x256xf32, #tpu.memory_space<vmem>>, vector<3x256xf32>
      %181 = vector.shape_cast %179 : vector<1x256xi1> to vector<1x256xi1>
      %182 = vector.broadcast %181 : vector<1x256xi1> to vector<3x256xi1>
      %183 = arith.select %182, %174, %180 : vector<3x256xi1>, vector<3x256xf32>
      %c0_33 = arith.constant 0 : index
      %c0_34 = arith.constant 0 : index
      %184 = vector.load %arg10[%c0_33, %c0_34] : memref<3x256xf32, #tpu.memory_space<vmem>>, vector<3x256xf32>
      tpu.vector_store %arg10[%c0_33, %c0_34], %183 {strides = array<i32>} : memref<3x256xf32, #tpu.memory_space<vmem>>, vector<3x256xf32>,
      %c0_35 = arith.constant 0 : index
      %c0_36 = arith.constant 0 : index
      %185 = vector.load %arg9[%c0_35, %c0_36] : memref<1x256xf32, #tpu.memory_space<vmem>>, vector<1x256xf32>
      %186 = arith.select %179, %148, %185 : vector<1x256xi1>, vector<1x256xf32>
      %c0_37 = arith.constant 0 : index
      %c0_38 = arith.constant 0 : index
      %187 = vector.load %arg9[%c0_37, %c0_38] : memref<1x256xf32, #tpu.memory_space<vmem>>, vector<1x256xf32>
      tpu.vector_store %arg9[%c0_37, %c0_38], %186 {strides = array<i32>} : memref<1x256xf32, #tpu.memory_space<vmem>>, vector<1x256xf32>,
    } else {
    }
    %c0_i32_9 = arith.constant 0 : i32
    %40 = arith.cmpi eq, %arg2, %c0_i32_9 : i32
    %41 = arith.extui %40 : i1 to i32
    %c0_i32_10 = arith.constant 0 : i32
    %42 = arith.cmpi ne, %41, %c0_i32_10 : i32
    scf.if %42 {
      %c0 = arith.constant 0 : index
      %c0_11 = arith.constant 0 : index
      %43 = vector.load %arg9[%c0, %c0_11] : memref<1x256xf32, #tpu.memory_space<vmem>>, vector<1x256xf32>
      %cst = arith.constant 1.000000e+06 : f32
      %44 = vector.broadcast %cst : f32 to vector<1x256xf32>
      %45 = arith.cmpf olt, %43, %44 : vector<1x256xf32>
      %46 = arith.extui %45 : vector<1x256xi1> to vector<1x256xi32>
      %47 = arith.sitofp %46 : vector<1x256xi32> to vector<1x256xf32>
      %c0_12 = arith.constant 0 : index
      %c0_13 = arith.constant 0 : index
      %48 = vector.load %arg10[%c0_12, %c0_13] : memref<3x256xf32, #tpu.memory_space<vmem>>, vector<3x256xf32>
      %49 = tpu.concatenate %48, %47 in 0 : vector<3x256xf32>, vector<1x256xf32> -> vector<4x256xf32>
      %c0_14 = arith.constant 0 : index
      %c0_15 = arith.constant 0 : index
      %c0_16 = arith.constant 0 : index
      %50 = vector.load %arg8[%c0_14, %c0_15, %c0_16] : memref<1x4x256xf32, #tpu.memory_space<vmem>>, vector<1x4x256xf32>
      %51 = vector.shape_cast %50 : vector<1x4x256xf32> to vector<4x256xf32>
      %52 = vector.shape_cast %49 : vector<4x256xf32> to vector<1x4x256xf32>
      tpu.vector_store %arg8[%c0_14, %c0_15, %c0_16], %52 {strides = array<i32>} : memref<1x4x256xf32, #tpu.memory_space<vmem>>, vector<1x4x256xf32>,
    } else {
    }
    return
  }
  func.func @transform_0(%arg0: i32, %arg1: i32, %arg2: i32, %arg3: memref<8xi32, #tpu.memory_space<smem>>, %arg4: memref<4xi32, #tpu.memory_space<smem>>) -> (i32, i32) {
    %c0_i32 = arith.constant 0 : i32
    %c0_i32_0 = arith.constant 0 : i32
    return %c0_i32, %arg1 : i32, i32
  }
  func.func @transform_1(%arg0: i32, %arg1: i32, %arg2: i32, %arg3: memref<8xi32, #tpu.memory_space<smem>>, %arg4: memref<4xi32, #tpu.memory_space<smem>>) -> (i32, i32, i32) {
    %c0_i32 = arith.constant 0 : i32
    %c0_i32_0 = arith.constant 0 : i32
    return %arg0, %arg2, %c0_i32 : i32, i32, i32
  }
  func.func @transform_2(%arg0: i32, %arg1: i32, %arg2: i32, %arg3: memref<8xi32, #tpu.memory_space<smem>>, %arg4: memref<4xi32, #tpu.memory_space<smem>>) -> (i32, i32, i32) {
    %c0_i32 = arith.constant 0 : i32
    %c0_i32_0 = arith.constant 0 : i32
    return %arg0, %c0_i32, %arg2 : i32, i32, i32
  }
  func.func @transform_3(%arg0: i32, %arg1: i32, %arg2: i32, %arg3: memref<8xi32, #tpu.memory_space<smem>>, %arg4: memref<4xi32, #tpu.memory_space<smem>>) -> (i32, i32, i32) {
    %c0_i32 = arith.constant 0 : i32
    %c0_i32_0 = arith.constant 0 : i32
    return %arg0, %c0_i32, %arg1 : i32, i32, i32
  }
}

</mosaic_0001>

<bundles_post_ra>
// kernel: _lambda_.1
= control target key start
LH: loop header
LB: loop body
LE: loop exit
PB: predicated region body
PF: predicated region fallthrough
CT: control target
= control target key end

     0   :  { %s1604_s24 = smov [#allocation5]   ;;  %s1605_s25 = smov [#allocation6]   ;;  %s2566_s0 = inlined_call_operand.vmem [shape: s32[8], index: 0, kind: input, shape index: {}]   ;;  %s2567_s2 = inlined_call_operand.vmem [shape: f32[2,256], index: 2, kind: input, shape index: {}]   ;;  %s2568_s3 = inlined_call_operand.vmem [shape: f32[2,32,22], index: 3, kind: input, shape index: {}]   ;;  %s2569_s4 = inlined_call_operand.vmem [shape: f32[2,3,96], index: 4, kind: input, shape index: {}]   ;;  %s2570_s5 = inlined_call_operand.vmem [shape: f32[2,4,256], index: 5, kind: output, shape index: {}]   ;;  %s2571_s1 = inlined_call_operand.vmem [shape: s32[4], index: 1, kind: input, shape index: {}]  }
   0x1   :  { %s11_s20 = sshll.u32 %s2566_s0, 4  ;;  %s16_s23 = sshll.u32 %s2571_s1, 4  ;;  %s12_s20 = int_to_ptr.vmem [resolvable:$true] %s11_s20  ;;  %s17_s23 = int_to_ptr.vmem [resolvable:$true] %s16_s23 }
   0x2   :  { %14 = dma.vmem_to_smem %s12_s20, 16, %s1604_s24, [#allocation4] }
   0x3   :  { %19 = dma.vmem_to_smem %s17_s23, 16, %s1605_s25, [#allocation4] }
   0x4   :  { %1590 = dma.done.wait [#allocation4], 32 }
   0x5   :  { %1591 = vsyncadd [#allocation4], 4294967264 }
   0x6   :  { %22 = sfence }
   0x7   :  { %s1666_s26 = smov 0   ;;  %s1668_s27 = smov 0  }
   0x8   :  { %s1670_s28 = smov 0  }
   0x9 LB: > { %s47_s0 = sadd.s32 1, %s1598_s27  ;;  %p1383_p0 = scmp.ge.s32.totalorder %s1602_s28, 1  ;;  %s1602_s28 = sphi %s1670_s28, %s28_s28   ;;  %s1598_s27 = sphi %s1668_s27, %s2680_s27   ;;  %s1594_s26 = sphi %s1666_s26, %s2679_s26  }
   0xa   : > { %p49_p1 = scmp.ge.s32.totalorder %s47_s0, 2  ;;  %p205_p2 = scmp.lt.s32.totalorder %s1602_s28, 3 }
   0xc   : > { %s2682_s0 = smov (%p49_p1, %s47_s0), 0  ;;  %p206_p3 = pnand %p1383_p0, %p205_p2 }
   0xe   : > { %209 = sbr.rel (%p206_p3) target bundleno = 684 (0x2ac), region = 32 }
  0x13   : > { %p256_p4 = scmp.lt.s32.totalorder %s1594_s26, 1  ;;  %v2576_v0 = vlaneseq  ;;  %s1389_s1 = sshll.u32 %s1594_s26, 2  ;;  %v2573_v1 = vmov 0.0   ;;  %v2583_v2 = vmov 0  ;;  %v1607_v3 = vmov 1000000.0  }
  0x14   : > { %291 = vst [vmem:[#allocation3] sm:$0x77] %v2573_v1  ;;  %s295_s29 = sld [smem:[#allocation5 + %s1389_s1]]  ;;  %s299_s30 = sadd.s32 1, %s1389_s1 }
  0x15   : > { %s2684_s26 = smov (!%p256_p4, %s1594_s26), 1  ;;  %vm1686_vm0 = vcmp.lt.s32.totalorder %v2576_v0, 256  ;;  %s1390_s6 = sld [smem:[#allocation6 + $0x1]] }
  0x16   : > { %v2584_v2 = vsel %vm1686_vm0, 4294967295, %v2583_v2  ;;  %290 = vst.msk [vmem:[#allocation2] sm:$0x3] %vm1686_vm0, %v1607_v3  ;;  %s305_s7 = sadd.s32 2, %s1389_s1  ;;  %s1423_s8 = sshll.u32 %s2684_s26, 5 }
  0x17   : > { %2585 = vst [vmem:[#allocation8_spill] sm:$0xff] %v2584_v2  ;;  %s1386_s9 = sshll.u32 %s2684_s26, 2  ;;  %s1695_s12 = scalar_lea.vmem %s2568_s3, %s1423_s8 }
  0x18   : > { %s1700_s15 = scalar_lea.vmem %s2569_s4, %s1386_s9  ;;  %s1424_s16 = sshll.u32 %s2684_s26, 3 }
  0x19   : > { %s300_s17 = sld [smem:[#allocation5 + %s299_s30]]  ;;  %s1705_s20 = scalar_lea.vmem %s2570_s5, %s1424_s16 }
  0x1a   : > { %s301_s21 = sld [smem:[#allocation6]]  ;;  %s312_s23 = sadd.s32 3, %s1389_s1 }
  0x1b   : > { %s306_s22 = sld [smem:[#allocation5 + %s305_s7]]  ;;  %p298_p5 = scmp.le.s32.totalorder %s295_s29, %s1390_s6 }
  0x1c   : > { %s1391_s24 = sld [smem:[#allocation6 + $0x3]] }
  0x1d   : > { %s313_s25 = sld [smem:[#allocation5 + %s312_s23]] }
  0x1e   : > { %s1392_s8 = sld [smem:[#allocation6 + $0x2]] }
  0x20   : > { %p302_p6 = scmp.ge.s32.totalorder %s300_s17, %s301_s21 }
  0x22   : > { %p303_p7 = pnand %p302_p6, %p298_p5  ;;  %p309_p8 = scmp.le.s32.totalorder %s306_s22, %s1391_s24 }
  0x24   : > { %p304_p9 = pneg %p303_p7  ;;  %p316_p11 = scmp.ge.s32.totalorder %s313_s25, %s1392_s8 }
  0x26   : > { %p310_p10 = pnand %p309_p8, %p304_p9 }
  0x28   : > { %p311_p12 = pneg %p310_p10 }
  0x2a   : > { %p317_p13 = pnand %p316_p11, %p311_p12 }
  0x2c   : > { %320 = sbr.rel (%p317_p13) target bundleno = 664 (0x298), region = 40 }
  0x31   : > { %v1708_v4 = vld [vmem:[%s1695_s12 + $0x10] sm:$0xff]  ;;  %v1711_v5 = vld [vmem:[%s1695_s12] sm:$0xff]  ;;  %v1608_v6 = vmov 1   ;;  %v2574_v7 = vmov 0   ;;  %v1719_v8 = vld [vmem:[%s1695_s12 + $0x18] sm:$0xff]  ;;  %v1610_v10 = vmov 2  }
  0x32   : > { %1477 = vset.pattern.permute.xlu2 %v1608_v6  ;;  %1476 = vset.pattern.permute.xlu1 %v2574_v7  ;;  %v1722_v9 = vld [vmem:[%s1695_s12 + $0x8] sm:$0xff]  ;;  %v1611_v11 = vmov 3   ;;  %v1612_v12 = vmov 4   ;;  %v1613_v13 = vmov 5   ;;  %v1614_v14 = vmov 6  }
  0x33   : > { %1475 = vset.pattern.permute.xlu0 %v2574_v7  ;;  %345 = vperm.xlu1 %1476, %v1708_v4   ;;  %v1615_v15 = vmov 7   ;;  %v1616_v16 = vmov 9   ;;  %v1617_v17 = vmov 10   ;;  %v1618_v18 = vmov 11  }
  0x34   : > { %362 = vperm.xlu2 %1477, %v1711_v5   ;;  %335 = vperm.xlu0 %1475, %v1711_v5   ;;  %v1619_v20 = vmov 14   ;;  %v1620_v22 = vmov 8   ;;  %v1621_v23 = vmov 16   ;;  %v325_v25 = vld [vmem:[%s2567_s2] ss:$2 sm:$0x3] }
  0x35   : > { %v1393_v26 = vld [vmem:[%s2567_s2 + $0x1] ss:$2 sm:$0x3]  ;;  %v1770_v27 = vperm.slane %v325_v25, 0  ;;  %v1775_v29 = vperm.slane %v325_v25, 1  ;;  %v1622_v34 = vmov 17  }
  0x36   : > { %v1773_v28 = vperm.slane %v1393_v26, 0  ;;  %v1778_v30 = vperm.slane %v1393_v26, 1  ;;  %v2588_v36 = vmov 0  ;;  %v1623_v42 = vmov 15  }
  0x37   : > { %v1624_v48 = vmov 21   ;;  %v2598_v49 = vmov 0  ;;  %v2600_v50 = vmov 0  ;;  %v1625_v54 = vmov 19  }
  0x38   : > { %v1626_v3 = vmov 20  }
  0x3b   : > { %350 = vperm.xlu1 %1476, %v1719_v8  }
  0x3c   : > { %366 = vperm.xlu2 %1477, %v1722_v9   ;;  %340 = vperm.xlu0 %1475, %v1722_v9  }
  0x43   : > { %1479 = vset.pattern.permute.xlu1 %v1608_v6 }
  0x44   : > { %1480 = vset.pattern.permute.xlu2 %v1610_v10  ;;  %1478 = vset.pattern.permute.xlu0 %v1608_v6  ;;  %v1627_v6 = vmov 13  }
  0x45   : > { %374 = vperm.xlu1 %1479, %v1719_v8   ;;  %399 = vperm.xlu2 %1480, %v1711_v5  }
  0x46   : > { %370 = vperm.xlu0 %1478, %v1708_v4  }
  0x4d   : > { %1481 = vset.pattern.permute.xlu1 %v1610_v10  ;;  %407 = vperm.xlu2 %1480, %v1708_v4  }
  0x4e   : > { %1482 = vset.pattern.permute.xlu0 %v1610_v10  ;;  %403 = vperm.xlu1 %1481, %v1722_v9  }
  0x4f   : > { %411 = vperm.xlu0 %1482, %v1719_v8  }
  0x55   : > { %1484 = vset.pattern.permute.xlu2 %v1611_v11 }
  0x56   : > { %1483 = vset.pattern.permute.xlu1 %v1611_v11  ;;  %435 = vperm.xlu2 %1484, %v1722_v9  }
  0x57   : > { %1485 = vset.pattern.permute.xlu0 %v1612_v12  ;;  %431 = vperm.xlu1 %1483, %v1711_v5  }
  0x58   : > { %463 = vperm.xlu0 %1485, %v1711_v5  }
  0x5e   : > { %443 = vperm.xlu2 %1484, %v1719_v8  }
  0x5f   : > { %439 = vperm.xlu1 %1483, %v1708_v4  }
  0x60   : > { %1489 = vset.pattern.permute.xlu0 %v1613_v13 }
  0x61   : > { %491 = vperm.xlu0 %1489, %v1722_v9  }
  0x66   : > { %1487 = vset.pattern.permute.xlu2 %v1612_v12 }
  0x67   : > { %1486 = vset.pattern.permute.xlu1 %v1612_v12  ;;  %471 = vperm.xlu2 %1487, %v1708_v4  }
  0x68   : > { %467 = vperm.xlu1 %1486, %v1722_v9  }
  0x69   : > { %1493 = vset.pattern.permute.xlu0 %v1614_v14 }
  0x6a   : > { %527 = vperm.xlu0 %1493, %v1708_v4  }
  0x6f   : > { %1488 = vset.pattern.permute.xlu2 %v1613_v13 }
  0x70   : > { %475 = vperm.xlu1 %1486, %v1719_v8   ;;  %487 = vperm.xlu2 %1488, %v1711_v5  }
  0x72   : > { %1496 = vset.pattern.permute.xlu0 %v1615_v15 }
  0x73   : > { %555 = vperm.xlu0 %1496, %v1719_v8  }
  0x78   : > { %1490 = vset.pattern.permute.xlu1 %v1613_v13  ;;  %499 = vperm.xlu2 %1488, %v1719_v8  }
  0x79   : > { %495 = vperm.xlu1 %1490, %v1708_v4  }
  0x7b   : > { %1499 = vset.pattern.permute.xlu0 %v1616_v16 }
  0x7c   : > { %599 = vperm.xlu0 %1499, %v1711_v5  }
  0x80   : > { %1492 = vset.pattern.permute.xlu2 %v1614_v14 }
  0x81   : > { %1491 = vset.pattern.permute.xlu1 %v1614_v14  ;;  %523 = vperm.xlu2 %1492, %v1722_v9  }
  0x82   : > { %519 = vperm.xlu1 %1491, %v1711_v5  }
  0x84   : > { %1503 = vset.pattern.permute.xlu0 %v1617_v17 }
  0x85   : > { %627 = vperm.xlu0 %1503, %v1722_v9  }
  0x89   : > { %1494 = vset.pattern.permute.xlu2 %v1615_v15 }
  0x8a   : > { %531 = vperm.xlu1 %1491, %v1719_v8   ;;  %543 = vperm.xlu2 %1494, %v1711_v5  }
  0x8d   : > { %1507 = vset.pattern.permute.xlu0 %v1618_v18 }
  0x8e   : > { %655 = vperm.xlu0 %1507, %v1708_v4   ;;  %v363_v19 = vpop.permute.xlu2 %362 }
  0x8f   : > { %vm377_vm1 = vcmp.le.f32.partialorder %v1770_v27, %v363_v19  ;;  %vm378_vm2 = vcmp.le.f32.partialorder %v1775_v29, %v363_v19 }
  0x92   : > { %1495 = vset.pattern.permute.xlu1 %v1615_v15  ;;  %551 = vperm.xlu2 %1494, %v1708_v4  }
  0x93   : > { %547 = vperm.xlu1 %1495, %v1722_v9  }
  0x96   : > { %1510 = vset.pattern.permute.xlu0 %v1619_v20  ;;  %v367_v21 = vpop.permute.xlu2 %366 }
  0x97   : > { %775 = vperm.xlu0 %1510, %v1711_v5   ;;  %vm379_vm11 = vcmp.le.f32.partialorder %v1770_v27, %v367_v21  ;;  %vm380_vm12 = vcmp.le.f32.partialorder %v1775_v29, %v367_v21 }
  0x9a   : > { %1498 = vset.pattern.permute.xlu2 %v1620_v22 }
  0x9b   : > { %1497 = vset.pattern.permute.xlu1 %v1620_v22  ;;  %571 = vperm.xlu2 %1498, %v1722_v9  }
  0x9c   : > { %567 = vperm.xlu1 %1497, %v1711_v5  }
  0x9f   : > { %1514 = vset.pattern.permute.xlu0 %v1621_v23  ;;  %v400_v24 = vpop.permute.xlu2 %399 }
  0xa0   : > { %835 = vperm.xlu0 %1514, %v1722_v9   ;;  %vm414_vm3 = vcmp.ge.f32.partialorder %v1773_v28, %v400_v24  ;;  %vm415_vm6 = vcmp.ge.f32.partialorder %v1778_v30, %v400_v24  ;;  %v1628_v24 = vmov 12  }
  0xa3   : > { %579 = vperm.xlu2 %1498, %v1719_v8  }
  0xa4   : > { %575 = vperm.xlu1 %1497, %v1708_v4  }
  0xa5   : > { %v346_v31 = vpop.permute.xlu1 %345 }
  0xa6   : > { %v336_v32 = vpop.permute.xlu0 %335 }
  0xa7   : > { %vm353_vm4 = vcmp.ge.f32.partialorder %v1770_v27, %v336_v32  ;;  %vm354_vm5 = vcmp.ge.f32.partialorder %v1775_v29, %v336_v32  ;;  %v408_v33 = vpop.permute.xlu2 %407 }
  0xa8   : > { %vm385_vm7 = vmand %vm353_vm4, %vm377_vm1  ;;  %1518 = vset.pattern.permute.xlu0 %v1622_v34 }
  0xa9   : > { %vm386_vm8 = vmand %vm354_vm5, %vm378_vm2  ;;  %863 = vperm.xlu0 %1518, %v1708_v4  }
  0xaa   : > { %vm1788_vm9 = vmand %vm385_vm7, %vm414_vm3 }
  0xab   : > { %1501 = vset.pattern.permute.xlu2 %v1616_v16  ;;  %vm1792_vm10 = vmand %vm386_vm8, %vm415_vm6 }
  0xac   : > { %v2589_v36 = vsel %vm1792_vm10, 4294967295, %v2588_v36  ;;  %1500 = vset.pattern.permute.xlu1 %v1616_v16  ;;  %607 = vperm.xlu2 %1501, %v1708_v4  }
  0xad   : > { %603 = vperm.xlu1 %1500, %v1722_v9   ;;  %v351_v37 = vpop.permute.xlu1 %350 }
  0xae   : > { %v341_v38 = vpop.permute.xlu0 %340  ;;  %vm359_vm2 = vcmp.ge.f32.partialorder %v1770_v27, %v351_v37  ;;  %vm360_vm5 = vcmp.ge.f32.partialorder %v1775_v29, %v351_v37 }
  0xaf   : > { %vm355_vm13 = vcmp.ge.f32.partialorder %v1770_v27, %v341_v38  ;;  %vm356_vm14 = vcmp.ge.f32.partialorder %v1775_v29, %v341_v38 }
  0xb0   : > { %vm1802_vm15 = vmand %vm355_vm13, %vm379_vm11  ;;  %v436_v40 = vpop.permute.xlu2 %435  ;;  %vm357_vm11 = vcmp.ge.f32.partialorder %v1770_v27, %v346_v31 }
  0xb1   : > { %vm1806_vm1 = vmand %vm356_vm14, %vm380_vm12  ;;  %1521 = vset.pattern.permute.xlu0 %v1623_v42  ;;  %vm418_vm12 = vcmp.ge.f32.partialorder %v1773_v28, %v408_v33  ;;  %vm358_vm14 = vcmp.ge.f32.partialorder %v1775_v29, %v346_v31 }
  0xb2   : > { %819 = vperm.xlu0 %1521, %v1719_v8  }
  0xb4   : > { %1502 = vset.pattern.permute.xlu2 %v1617_v17 }
  0xb5   : > { %611 = vperm.xlu1 %1500, %v1719_v8   ;;  %623 = vperm.xlu2 %1502, %v1711_v5  }
  0xb7   : > { %v375_v43 = vpop.permute.xlu1 %374 }
  0xb8   : > { %vm383_vm3 = vcmp.le.f32.partialorder %v1770_v27, %v375_v43  ;;  %vm384_vm4 = vcmp.le.f32.partialorder %v1775_v29, %v375_v43  ;;  %v371_v44 = vpop.permute.xlu0 %370  ;;  %v444_v45 = vpop.permute.xlu2 %443 }
  0xb9   : > { %vm1819_vm6 = vmand %vm359_vm2, %vm383_vm3  ;;  %vm381_vm7 = vcmp.le.f32.partialorder %v1770_v27, %v371_v44  ;;  %vm382_vm8 = vcmp.le.f32.partialorder %v1775_v29, %v371_v44  ;;  %vm419_vm2 = vcmp.ge.f32.partialorder %v1778_v30, %v408_v33 }
  0xba   : > { %vm1827_vm13 = vmand %vm360_vm5, %vm384_vm4  ;;  %1524 = vset.pattern.permute.xlu0 %v1624_v48  ;;  %vm448_vm5 = vcmp.le.f32.partialorder %v1773_v28, %v436_v40 }
  0xbb   : > { %vm389_vm3 = vmand %vm357_vm11, %vm381_vm7  ;;  %911 = vperm.xlu0 %1524, %v1711_v5   ;;  %vm449_vm11 = vcmp.le.f32.partialorder %v1778_v30, %v436_v40 }
  0xbc   : > { %vm390_vm0 = vmand %vm358_vm14, %vm382_vm8 }
  0xbd   : > { %1504 = vset.pattern.permute.xlu1 %v1617_v17  ;;  %635 = vperm.xlu2 %1502, %v1719_v8   ;;  %vm1837_vm10 = vmand %vm389_vm3, %vm418_vm12 }
  0xbe   : > { %v2599_v49 = vsel %vm1837_vm10, 4294967295, %v2598_v49  ;;  %631 = vperm.xlu1 %1504, %v1708_v4   ;;  %vm1842_vm4 = vmand %vm390_vm0, %vm419_vm2 }
  0xbf   : > { %v2601_v50 = vsel %vm1842_vm4, 4294967295, %v2600_v50  ;;  %vm452_vm4 = vcmp.le.f32.partialorder %v1773_v28, %v444_v45 }
  0xc0   : > { %v404_v51 = vpop.permute.xlu1 %403 }
  0xc1   : > { %vm416_vm7 = vcmp.ge.f32.partialorder %v1773_v28, %v404_v51  ;;  %vm417_vm8 = vcmp.ge.f32.partialorder %v1778_v30, %v404_v51  ;;  %v412_v52 = vpop.permute.xlu0 %411  ;;  %v1849_v53 = vpop.permute.xlu2 %471 }
  0xc2   : > { %vm424_vm12 = vmand %vm1802_vm15, %vm416_vm7  ;;  %vm420_vm14 = vcmp.ge.f32.partialorder %v1773_v28, %v412_v52  ;;  %vm421_vm3 = vcmp.ge.f32.partialorder %v1778_v30, %v412_v52  ;;  %vm453_vm15 = vcmp.le.f32.partialorder %v1778_v30, %v444_v45  ;;  %v482_v52 = vmul.f32 %v1849_v53, %v1770_v27 }
  0xc3   : > { %vm425_vm0 = vmand %vm1806_vm1, %vm417_vm8  ;;  %1528 = vset.pattern.permute.xlu0 %v1625_v54 }
  0xc4   : > { %vm1858_vm2 = vmand %vm424_vm12, %vm448_vm5  ;;  %939 = vperm.xlu0 %1528, %v1722_v9  }
  0xc5   : > { %vm1865_vm10 = vmand %vm425_vm0, %vm449_vm11  ;;  %1506 = vset.pattern.permute.xlu2 %v1618_v18 }
  0xc6   : > { %vm428_vm1 = vmand %vm1819_vm6, %vm420_vm14  ;;  %1505 = vset.pattern.permute.xlu1 %v1618_v18  ;;  %651 = vperm.xlu2 %1506, %v1722_v9   ;;  %vm2615_vm14 = vnez %v2599_v49 }
  0xc7   : > { %vm429_vm5 = vmand %vm1827_vm13, %vm421_vm3  ;;  %647 = vperm.xlu1 %1505, %v1711_v5  }
  0xc8   : > { %vm1878_vm7 = vmand %vm428_vm1, %vm452_vm4  ;;  %vm2612_vm4 = vnez %v2589_v36 }
  0xc9   : > { %vm1882_vm8 = vmand %vm429_vm5, %vm453_vm15  ;;  %v432_v59 = vpop.permute.xlu1 %431  ;;  %vm2618_vm15 = vnez %v2601_v50 }
  0xca   : > { %vm446_vm6 = vcmp.le.f32.partialorder %v1773_v28, %v432_v59  ;;  %vm447_vm11 = vcmp.le.f32.partialorder %v1778_v30, %v432_v59  ;;  %v488_v60 = vpop.permute.xlu2 %487  ;;  %v464_v61 = vpop.permute.xlu0 %463  ;;  %v483_v59 = vmul.f32 %v1849_v53, %v1775_v29 }
  0xcb   : > { %vm1890_vm13 = vmand %vm1788_vm9, %vm446_vm6  ;;  %v502_v10 = vmul.f32 %v488_v60, %v1773_v28  ;;  %v503_v11 = vmul.f32 %v488_v60, %v1778_v30  ;;  %v478_v12 = vmul.f32 %v464_v61, %v1770_v27  ;;  %v479_v13 = vmul.f32 %v464_v61, %v1775_v29 }
  0xcc   : > { %vm1896_vm12 = vmand %vm2612_vm4, %vm447_vm11  ;;  %1532 = vset.pattern.permute.xlu0 %v1626_v3 }
  0xcd   : > { %967 = vperm.xlu0 %1532, %v1708_v4   ;;  %v510_v17 = vadd.f32 %v502_v10, %v478_v12  ;;  %v511_v19 = vadd.f32 %v503_v11, %v479_v13 }
  0xce   : > { %1509 = vset.pattern.permute.xlu2 %v1627_v6 }
  0xcf   : > { %1508 = vset.pattern.permute.xlu1 %v1627_v6  ;;  %755 = vperm.xlu2 %1509, %v1722_v9  }
  0xd0   : > { %751 = vperm.xlu1 %1508, %v1711_v5  }
  0xd1   : > { %v440_v14 = vpop.permute.xlu1 %439 }
  0xd2   : > { %vm450_vm9 = vcmp.le.f32.partialorder %v1773_v28, %v440_v14  ;;  %vm451_vm0 = vcmp.le.f32.partialorder %v1778_v30, %v440_v14  ;;  %v500_v15 = vpop.permute.xlu2 %499 }
  0xd3   : > { %vm1912_vm3 = vmand %vm2615_vm14, %vm450_vm9  ;;  %v492_v22 = vpop.permute.xlu0 %491  ;;  %v508_v41 = vmul.f32 %v500_v15, %v1773_v28  ;;  %v509_v43 = vmul.f32 %v500_v15, %v1778_v30 }
  0xd4   : > { %vm1918_vm1 = vmand %vm2618_vm15, %vm451_vm0  ;;  %v504_v25 = vmul.f32 %v492_v22, %v1773_v28  ;;  %v505_v26 = vmul.f32 %v492_v22, %v1778_v30 }
  0xd5   : > { %1536 = vset.pattern.permute.xlu0 %v1628_v24 }
  0xd6   : > { %687 = vperm.xlu0 %1536, %v1708_v4  }
  0xd7   : > { %763 = vperm.xlu2 %1509, %v1719_v8  }
  0xd8   : > { %759 = vperm.xlu1 %1508, %v1708_v4  }
  0xda   : > { %v468_v31 = vpop.permute.xlu1 %467 }
  0xdb   : > { %v480_v32 = vmul.f32 %v468_v31, %v1770_v27  ;;  %v481_v33 = vmul.f32 %v468_v31, %v1775_v29  ;;  %v524_v35 = vpop.permute.xlu2 %523 }
  0xdc   : > { %v528_v36 = vpop.permute.xlu0 %527 }
  0xdd   : > { %v512_v37 = vadd.f32 %v504_v25, %v480_v32  ;;  %v513_v38 = vadd.f32 %v505_v26, %v481_v33 }
  0xde   : > { %1537 = vset.pattern.permute.xlu0 %v1626_v3 }
  0xdf   : > { %v1931_v39 = vadd.f32 %v524_v35, %v512_v37  ;;  %v1933_v40 = vadd.f32 %v524_v35, %v513_v38  ;;  %1512 = vset.pattern.permute.xlu2 %v1619_v20 }
  0xe0   : > { %1511 = vset.pattern.permute.xlu1 %v1619_v20  ;;  %783 = vperm.xlu2 %1512, %v1708_v4  }
  0xe1   : > { %779 = vperm.xlu1 %1511, %v1722_v9  }
  0xe2   : > { %v476_v44 = vpop.permute.xlu1 %475 }
  0xe3   : > { %v484_v45 = vmul.f32 %v476_v44, %v1770_v27  ;;  %v485_v46 = vmul.f32 %v476_v44, %v1775_v29 }
  0xe4   : > { %v544_v47 = vpop.permute.xlu2 %543 }
  0xe5   : > { %v556_v49 = vpop.permute.xlu0 %555  ;;  %v516_v50 = vadd.f32 %v508_v41, %v484_v45  ;;  %v517_v51 = vadd.f32 %v509_v43, %v485_v46 }
  0xe6   : > { %v565_v31 = vmul.f32 %v556_v49, %v1775_v29 }
  0xe8   : > { %1513 = vset.pattern.permute.xlu2 %v1621_v23 }
  0xe9   : > { %787 = vperm.xlu1 %1511, %v1719_v8   ;;  %831 = vperm.xlu2 %1513, %v1711_v5  }
  0xeb   : > { %v496_v20 = vpop.permute.xlu1 %495 }
  0xec   : > { %v506_v60 = vmul.f32 %v496_v20, %v1773_v28  ;;  %v507_v61 = vmul.f32 %v496_v20, %v1778_v30  ;;  %v1952_v6 = vpop.permute.xlu2 %551 }
  0xee   : > { %v514_v10 = vadd.f32 %v506_v60, %v482_v52  ;;  %v515_v11 = vadd.f32 %v507_v61, %v483_v59  ;;  %v600_v12 = vpop.permute.xlu0 %599  ;;  %v558_v59 = vmul.f32 %v544_v47, %v1770_v27  ;;  %v559_v60 = vmul.f32 %v544_v47, %v1775_v29 }
  0xf0   : > { %v1954_v13 = vadd.f32 %v528_v36, %v514_v10  ;;  %v1956_v14 = vadd.f32 %v528_v36, %v515_v11 }
  0xf1   : > { %1515 = vset.pattern.permute.xlu1 %v1621_v23  ;;  %843 = vperm.xlu2 %1513, %v1719_v8   ;;  %v564_v23 = vmul.f32 %v556_v49, %v1770_v27 }
  0xf2   : > { %839 = vperm.xlu1 %1515, %v1708_v4  }
  0xf4   : > { %v520_v53 = vpop.permute.xlu1 %519 }
  0xf5   : > { %v534_v15 = vadd.f32 %v520_v53, %v510_v17  ;;  %v535_v22 = vadd.f32 %v520_v53, %v511_v19  ;;  %v572_v25 = vpop.permute.xlu2 %571 }
  0xf6   : > { %v584_v41 = vmul.f32 %v572_v25, %v1773_v28  ;;  %v585_v43 = vmul.f32 %v572_v25, %v1778_v30 }
  0xf7   : > { %v1961_v26 = vpop.permute.xlu0 %627 }
  0xf8   : > { %v641_v21 = vmul.f32 %v1961_v26, %v1775_v29 }
  0xf9   : > { %1517 = vset.pattern.permute.xlu2 %v1622_v34 }
  0xfa   : > { %1516 = vset.pattern.permute.xlu1 %v1622_v34  ;;  %859 = vperm.xlu2 %1517, %v1722_v9  }
  0xfb   : > { %855 = vperm.xlu1 %1516, %v1711_v5  }
  0xfc   : > { %v532_v32 = vpop.permute.xlu1 %531 }
  0xfd   : > { %v1969_v33 = vadd.f32 %v532_v32, %v516_v50  ;;  %v1971_v17 = vadd.f32 %v532_v32, %v517_v51  ;;  %v580_v19 = vpop.permute.xlu2 %579 }
  0xfe   : > { %v588_v35 = vmul.f32 %v580_v19, %v1773_v28  ;;  %v589_v36 = vmul.f32 %v580_v19, %v1778_v30 }
 0x100   : > { %v1975_v37 = vpop.permute.xlu0 %655  ;;  %v1977_v34 = vadd.f32 %v588_v35, %v564_v23  ;;  %v1979_v38 = vadd.f32 %v589_v36, %v565_v31  ;;  %v562_v35 = vmul.f32 %v1952_v6, %v1770_v27  ;;  %v563_v36 = vmul.f32 %v1952_v6, %v1775_v29 }
 0x102   : > { %1519 = vset.pattern.permute.xlu2 %v1623_v42 }
 0x103   : > { %867 = vperm.xlu1 %1516, %v1719_v8   ;;  %807 = vperm.xlu2 %1519, %v1711_v5  }
 0x105   : > { %v548_v44 = vpop.permute.xlu1 %547 }
 0x106   : > { %v560_v45 = vmul.f32 %v548_v44, %v1770_v27  ;;  %v561_v46 = vmul.f32 %v548_v44, %v1775_v29  ;;  %v608_v49 = vpop.permute.xlu2 %607 }
 0x108   : > { %v592_v50 = vadd.f32 %v584_v41, %v560_v45  ;;  %v593_v51 = vadd.f32 %v585_v43, %v561_v46 }
 0x109   : > { %v1988_v20 = vpop.permute.xlu0 %775 }
 0x10b   : > { %1520 = vset.pattern.permute.xlu1 %v1623_v42  ;;  %815 = vperm.xlu2 %1519, %v1708_v4   ;;  %v1629_v42 = vmov 18  }
 0x10c   : > { %811 = vperm.xlu1 %1520, %v1722_v9  }
 0x10e   : > { %v568_v52 = vpop.permute.xlu1 %567 }
 0x10f   : > { %v582_v61 = vmul.f32 %v568_v52, %v1773_v28  ;;  %v583_v10 = vmul.f32 %v568_v52, %v1778_v30  ;;  %v1997_v11 = vpop.permute.xlu2 %623 }
 0x110   : > { %v639_v58 = vmul.f32 %v1997_v11, %v1775_v29 }
 0x111   : > { %v590_v53 = vadd.f32 %v582_v61, %v558_v59  ;;  %v591_v25 = vadd.f32 %v583_v10, %v559_v60 }
 0x112   : > { %v1999_v23 = vpop.permute.xlu0 %835 }
 0x113   : > { %1523 = vset.pattern.permute.xlu2 %v1629_v42  ;;  %v2001_v31 = vadd.f32 %v600_v12, %v590_v53  ;;  %v2003_v32 = vadd.f32 %v600_v12, %v591_v25  ;;  %v849_v25 = vmul.f32 %v1999_v23, %v1775_v29 }
 0x114   : > { %1522 = vset.pattern.permute.xlu1 %v1629_v42  ;;  %891 = vperm.xlu2 %1523, %v1722_v9  }
 0x115   : > { %887 = vperm.xlu1 %1522, %v1711_v5   ;;  %v702_v47 = vmul.f32 %v2001_v31, %v534_v15  ;;  %v703_v19 = vmul.f32 %v2003_v32, %v535_v22 }
 0x116   : > { %v576_v41 = vpop.permute.xlu1 %575 }
 0x117   : > { %v586_v43 = vmul.f32 %v576_v41, %v1773_v28  ;;  %v587_v12 = vmul.f32 %v576_v41, %v1778_v30  ;;  %v2015_v44 = vpop.permute.xlu2 %635  ;;  %vm710_vm5 = vcmp.ge.f32.partialorder %v702_v47, 0.0  ;;  %vm711_vm6 = vcmp.ge.f32.partialorder %v703_v19, 0.0 }
 0x118   : > { %vm2019_vm11 = vmand %vm1890_vm13, %vm710_vm5 }
 0x119   : > { %v594_v22 = vadd.f32 %v586_v43, %v562_v35  ;;  %v595_v45 = vadd.f32 %v587_v12, %v563_v36  ;;  %vm2025_vm4 = vmand %vm1896_vm12, %vm711_vm6  ;;  %v638_v12 = vmul.f32 %v1997_v11, %v1770_v27 }
 0x11b   : > { %v2029_v46 = vpop.permute.xlu0 %863  ;;  %v2031_v52 = vadd.f32 %v608_v49, %v594_v22  ;;  %v2033_v59 = vadd.f32 %v608_v49, %v595_v45 }
 0x11c   : > { %899 = vperm.xlu2 %1523, %v1719_v8  }
 0x11d   : > { %895 = vperm.xlu1 %1522, %v1708_v4   ;;  %v706_v62 = vmul.f32 %v2031_v52, %v1954_v13  ;;  %v707_v63 = vmul.f32 %v2033_v59, %v1956_v14 }
 0x11f   : > { %v604_v60 = vpop.permute.xlu1 %603  ;;  %vm714_vm13 = vcmp.ge.f32.partialorder %v706_v62, 0.0  ;;  %vm715_vm12 = vcmp.ge.f32.partialorder %v707_v63, 0.0 }
 0x120   : > { %v2041_v61 = vadd.f32 %v604_v60, %v592_v50  ;;  %v2043_v10 = vadd.f32 %v604_v60, %v593_v51  ;;  %v652_v53 = vpop.permute.xlu2 %651  ;;  %vm2047_vm9 = vmand %vm1912_vm3, %vm714_vm13  ;;  %v640_v51 = vmul.f32 %v1961_v26, %v1770_v27  ;;  %v666_v60 = vmul.f32 %v1975_v37, %v1773_v28 }
 0x121   : > { %vm2053_vm0 = vmand %vm1918_vm1, %vm715_vm12 }
 0x122   : > { %v704_v14 = vmul.f32 %v2041_v61, %v1931_v39  ;;  %v705_v50 = vmul.f32 %v2043_v10, %v1933_v40  ;;  %v664_v39 = vmul.f32 %v652_v53, %v1773_v28  ;;  %v665_v40 = vmul.f32 %v652_v53, %v1778_v30 }
 0x123   : > { %v667_v53 = vmul.f32 %v1975_v37, %v1778_v30 }
 0x124   : > { %vm712_vm14 = vcmp.ge.f32.partialorder %v704_v14, 0.0  ;;  %vm713_vm3 = vcmp.ge.f32.partialorder %v705_v50, 0.0  ;;  %1526 = vset.pattern.permute.xlu2 %v1624_v48  ;;  %v2064_v16 = vpop.permute.xlu0 %819  ;;  %v2093_v19 = vadd.f32 %v664_v39, %v640_v51  ;;  %v2095_v35 = vadd.f32 %v665_v40, %v641_v21 }
 0x125   : > { %1525 = vset.pattern.permute.xlu1 %v1624_v48  ;;  %919 = vperm.xlu2 %1526, %v1708_v4   ;;  %vm2074_vm15 = vmand %vm1858_vm2, %vm712_vm14 }
 0x126   : > { %915 = vperm.xlu1 %1525, %v1722_v9   ;;  %vm2081_vm1 = vmand %vm1865_vm10, %vm713_vm3 }
 0x127   : > { %v612_v48 = vpop.permute.xlu1 %611 }
 0x128   : > { %v2086_v42 = vadd.f32 %v612_v48, %v1977_v34  ;;  %v2089_v47 = vadd.f32 %v612_v48, %v1979_v38  ;;  %v2633_v38 = vmov 0 }
 0x129   : > { %v2091_v55 = vpop.permute.xlu2 %755 }
 0x12a   : > { %v708_v56 = vmul.f32 %v2086_v42, %v1969_v33  ;;  %v709_v36 = vmul.f32 %v2089_v47, %v1971_v17  ;;  %v2636_v33 = vmov 0  ;;  %v768_v49 = vmul.f32 %v2091_v55, %v1770_v27 }
 0x12c   : > { %vm716_vm10 = vcmp.ge.f32.partialorder %v708_v56, 0.0  ;;  %vm717_vm2 = vcmp.ge.f32.partialorder %v709_v36, 0.0 }
 0x12d   : > { %1527 = vset.pattern.permute.xlu2 %v1625_v54  ;;  %v2102_v34 = vpop.permute.xlu0 %911  ;;  %vm2106_vm5 = vmand %vm1878_vm7, %vm716_vm10 }
 0x12e   : > { %v2634_v38 = vsel %vm2106_vm5, 4294967295, %v2633_v38  ;;  %923 = vperm.xlu1 %1525, %v1719_v8   ;;  %935 = vperm.xlu2 %1527, %v1711_v5   ;;  %vm2114_vm6 = vmand %vm1882_vm8, %vm717_vm2 }
 0x12f   : > { %2635 = vst [vmem:[#allocation9_spill] sm:$0xff] %v2634_v38  ;;  %v2637_v33 = vsel %vm2114_vm6, 4294967295, %v2636_v33 }
 0x130   : > { %2638 = vst [vmem:[#allocation10_spill] sm:$0xff] %v2637_v33  ;;  %v632_v17 = vpop.permute.xlu1 %631 }
 0x131   : > { %v2118_v41 = vpop.permute.xlu2 %763  ;;  %v642_v14 = vmul.f32 %v632_v17, %v1770_v27  ;;  %v643_v50 = vmul.f32 %v632_v17, %v1775_v29 }
 0x133   : > { %v675_v21 = vadd.f32 %v667_v53, %v643_v50 }
 0x136   : > { %1529 = vset.pattern.permute.xlu1 %v1625_v54  ;;  %947 = vperm.xlu2 %1527, %v1719_v8   ;;  %v2122_v57 = vpop.permute.xlu0 %939 }
 0x137   : > { %943 = vperm.xlu1 %1529, %v1708_v4  }
 0x139   : > { %v648_v43 = vpop.permute.xlu1 %647 }
 0x13a   : > { %v662_v22 = vmul.f32 %v648_v43, %v1773_v28  ;;  %v663_v45 = vmul.f32 %v648_v43, %v1778_v30  ;;  %v784_v62 = vpop.permute.xlu2 %783 }
 0x13b   : > { %v794_v40 = vmul.f32 %v784_v62, %v1773_v28  ;;  %v795_v48 = vmul.f32 %v784_v62, %v1778_v30 }
 0x13c   : > { %v2131_v63 = vadd.f32 %v662_v22, %v638_v12  ;;  %v2133_v54 = vadd.f32 %v663_v45, %v639_v58 }
 0x13e   : > { %1531 = vset.pattern.permute.xlu2 %v1626_v3 }
 0x13f   : > { %1530 = vset.pattern.permute.xlu1 %v1626_v3  ;;  %963 = vperm.xlu2 %1531, %v1722_v9   ;;  %v2138_v4 = vpop.permute.xlu0 %967  ;;  %v674_v3 = vadd.f32 %v666_v60, %v642_v14  ;;  %v769_v60 = vmul.f32 %v2091_v55, %v1775_v29  ;;  %v772_v55 = vmul.f32 %v2118_v41, %v1770_v27 }
 0x140   : > { %959 = vperm.xlu1 %1530, %v1711_v5  }
 0x142   : > { %v2141_v11 = vpop.permute.xlu1 %751 }
 0x143   : > { %v832_v51 = vpop.permute.xlu2 %831 }
 0x147   : > { %1533 = vset.pattern.permute.xlu2 %v1618_v18 }
 0x148   : > { %v688_v39 = vpop.permute.xlu0 %687  ;;  %971 = vperm.xlu1 %1530, %v1719_v8   ;;  %659 = vperm.xlu2 %1533, %v1719_v8  }
 0x149   : > { %v698_v56 = vadd.f32 %v688_v39, %v674_v3  ;;  %v699_v37 = vadd.f32 %v688_v39, %v675_v21  ;;  %v773_v21 = vmul.f32 %v2118_v41, %v1775_v29 }
 0x14a   : > { %v760_v36 = vpop.permute.xlu1 %759 }
 0x14b   : > { %v730_v43 = vmul.f32 %v698_v56, %v2031_v52  ;;  %v731_v17 = vmul.f32 %v699_v37, %v2033_v59  ;;  %v770_v18 = vmul.f32 %v760_v36, %v1770_v27  ;;  %v771_v12 = vmul.f32 %v760_v36, %v1775_v29  ;;  %v844_v58 = vpop.permute.xlu2 %843 }
 0x14d   : > { %vm738_vm7 = vcmp.ge.f32.partialorder %v730_v43, 0.0  ;;  %vm739_vm8 = vcmp.ge.f32.partialorder %v731_v17, 0.0  ;;  %v2158_v22 = vadd.f32 %v794_v40, %v770_v18  ;;  %v2160_v45 = vadd.f32 %v795_v48, %v771_v12 }
 0x14e   : > { %vm2164_vm13 = vmand %vm2047_vm9, %vm738_vm7  ;;  %v846_v12 = vmul.f32 %v832_v51, %v1770_v27 }
 0x14f   : > { %vm2170_vm12 = vmand %vm2053_vm0, %vm739_vm8 }
 0x150   : > { %1534 = vset.pattern.permute.xlu1 %v1628_v24  ;;  %1535 = vset.pattern.permute.xlu2 %v1628_v24 }
 0x151   : > { %679 = vperm.xlu1 %1534, %v1711_v5   ;;  %683 = vperm.xlu2 %1535, %v1722_v9   ;;  %v791_v5 = vmul.f32 %v1988_v20, %v1778_v30  ;;  %v767_v9 = vmul.f32 %v2141_v11, %v1775_v29 }
 0x153   : > { %v780_v59 = vpop.permute.xlu1 %779  ;;  %v799_v48 = vadd.f32 %v791_v5, %v767_v9  ;;  %v852_v5 = vmul.f32 %v844_v58, %v1770_v27  ;;  %v853_v9 = vmul.f32 %v844_v58, %v1775_v29 }
 0x154   : > { %v792_v13 = vmul.f32 %v780_v59, %v1773_v28  ;;  %v793_v53 = vmul.f32 %v780_v59, %v1778_v30  ;;  %v2184_v14 = vpop.permute.xlu2 %859  ;;  %v847_v59 = vmul.f32 %v832_v51, %v1775_v29 }
 0x155   : > { %v873_v26 = vmul.f32 %v2184_v14, %v1778_v30 }
 0x156   : > { %v2186_v50 = vadd.f32 %v792_v13, %v768_v49  ;;  %v801_v24 = vadd.f32 %v793_v53, %v769_v60 }
 0x159   : > { %691 = vperm.xlu1 %1534, %v1719_v8  }
 0x15b   : > { %v788_v3 = vpop.permute.xlu1 %787 }
 0x15c   : > { %v796_v39 = vmul.f32 %v788_v3, %v1773_v28  ;;  %v797_v40 = vmul.f32 %v788_v3, %v1778_v30 }
 0x15d   : > { %v2199_v56 = vpop.permute.xlu2 %807 }
 0x15e   : > { %v804_v37 = vadd.f32 %v796_v39, %v772_v55  ;;  %v805_v36 = vadd.f32 %v797_v40, %v773_v21  ;;  %v2202_v43 = vadd.f32 %v2199_v56, %v799_v48 }
 0x160   : > { %v2217_v3 = vadd.f32 %v2064_v16, %v804_v37  ;;  %v2220_v51 = vadd.f32 %v2064_v16, %v805_v36 }
 0x162   : > { %v1097_v58 = vsub.f32 1.0, %v2217_v3 }
 0x164   : > { %v840_v8 = vpop.permute.xlu1 %839 }
 0x165   : > { %v816_v17 = vpop.permute.xlu2 %815 }
 0x16d   : > { %v856_v18 = vpop.permute.xlu1 %855 }
 0x16e   : > { %v870_v41 = vmul.f32 %v856_v18, %v1773_v28  ;;  %v871_v49 = vmul.f32 %v856_v18, %v1778_v30  ;;  %v2208_v60 = vpop.permute.xlu2 %891 }
 0x170   : > { %v2210_v13 = vadd.f32 %v870_v41, %v846_v12  ;;  %v2212_v53 = vadd.f32 %v871_v49, %v847_v59  ;;  %v1098_v41 = vsub.f32 1.0, %v2220_v51 }
 0x175   : > { %v868_v55 = vpop.permute.xlu1 %867 }
 0x176   : > { %v876_v21 = vmul.f32 %v868_v55, %v1773_v28  ;;  %v877_v39 = vmul.f32 %v868_v55, %v1778_v30  ;;  %v900_v40 = vpop.permute.xlu2 %899 }
 0x178   : > { %v884_v48 = vadd.f32 %v876_v21, %v852_v5  ;;  %v885_v18 = vadd.f32 %v877_v39, %v853_v9  ;;  %v874_v21 = vmul.f32 %v2029_v46, %v1773_v28  ;;  %v875_v39 = vmul.f32 %v2029_v46, %v1778_v30 }
 0x17a   : > { %v2224_v12 = vadd.f32 %v900_v40, %v884_v48  ;;  %v2226_v59 = vadd.f32 %v900_v40, %v885_v18  ;;  %v850_v40 = vmul.f32 %v840_v8, %v1770_v27  ;;  %v851_v48 = vmul.f32 %v840_v8, %v1775_v29 }
 0x17b   : > { %v2250_v18 = vadd.f32 %v816_v17, %v2158_v22 }
 0x17c   : > { %v2231_v37 = vsub.f32 %v1097_v58, %v2224_v12  ;;  %v2234_v16 = vsub.f32 %v1098_v41, %v2226_v59  ;;  %v882_v58 = vadd.f32 %v874_v21, %v850_v40  ;;  %v883_v41 = vadd.f32 %v875_v39, %v851_v48 }
 0x17d   : > { %2645 = vst [vmem:[#allocation13_spill] sm:$0xff] %v2250_v18  ;;  %v1095_v46 = vsub.f32 1.0, %v2250_v18 }
 0x17e   : > { %2643 = vst [vmem:[#allocation11_spill] sm:$0xff] %v2231_v37  ;;  %v2236_v36 = vpop.permute.xlu1 %811 }
 0x17f   : > { %2644 = vst [vmem:[#allocation12_spill] sm:$0xff] %v2234_v16  ;;  %v2239_v49 = vadd.f32 %v2236_v36, %v801_v24  ;;  %v920_v5 = vpop.permute.xlu2 %919  ;;  %v2253_v24 = vadd.f32 %v816_v17, %v2160_v45 }
 0x181   : > { %v1096_v37 = vsub.f32 1.0, %v2253_v24  ;;  %v931_v40 = vmul.f32 %v920_v5, %v2253_v24 }
 0x187   : > { %v888_v9 = vpop.permute.xlu1 %887 }
 0x188   : > { %v2241_v55 = vpop.permute.xlu2 %935 }
 0x18f   : > { %v896_v1 = vpop.permute.xlu1 %895 }
 0x190   : > { %v2255_v7 = vadd.f32 %v896_v1, %v882_v58  ;;  %v2257_v0 = vadd.f32 %v896_v1, %v883_v41  ;;  %v948_v16 = vpop.permute.xlu2 %947  ;;  %v930_v1 = vmul.f32 %v920_v5, %v2250_v18 }
 0x192   : > { %v2262_v8 = vsub.f32 %v1095_v46, %v2255_v7  ;;  %v2265_v22 = vsub.f32 %v1096_v37, %v2257_v0  ;;  %v978_v46 = vmul.f32 %v2138_v4, %v2255_v7  ;;  %v979_v37 = vmul.f32 %v2138_v4, %v2257_v0 }
 0x194   : > { %2646 = vst [vmem:[#allocation14_spill] sm:$0xff] %v2262_v8 }
 0x195   : > { %2647 = vst [vmem:[#allocation15_spill] sm:$0xff] %v2265_v22 }
 0x198   : > { %v916_v45 = vpop.permute.xlu1 %915 }
 0x199   : > { %v2267_v17 = vpop.permute.xlu2 %963 }
 0x1a0   : > { %v924_v21 = vpop.permute.xlu1 %923 }
 0x1a2   : > { %v2269_v39 = vpop.permute.xlu2 %659 }
 0x1a9   : > { %v944_v48 = vpop.permute.xlu1 %943 }
 0x1aa   : > { %v954_v58 = vadd.f32 %v944_v48, %v930_v1  ;;  %v955_v41 = vadd.f32 %v944_v48, %v931_v40  ;;  %v790_v1 = vmul.f32 %v1988_v20, %v1773_v28  ;;  %v766_v40 = vmul.f32 %v2141_v11, %v1770_v27 }
 0x1ab   : > { %v684_v22 = vpop.permute.xlu2 %683  ;;  %v848_v20 = vmul.f32 %v1999_v23, %v1770_v27  ;;  %v933_v23 = vmul.f32 %v924_v21, %v2220_v51  ;;  %v881_v48 = vadd.f32 %v873_v26, %v849_v25 }
 0x1ac   : > { %v986_v8 = vadd.f32 %v978_v46, %v954_v58  ;;  %v987_v2 = vadd.f32 %v979_v37, %v955_v41  ;;  %v696_v33 = vadd.f32 %v684_v22, %v2093_v19  ;;  %v697_v38 = vadd.f32 %v684_v22, %v2095_v35 }
 0x1ad   : > { %v798_v35 = vadd.f32 %v790_v1, %v766_v40  ;;  %v2319_v58 = vadd.f32 %v888_v9, %v2210_v13  ;;  %v927_v40 = vmul.f32 %v2102_v34, %v2202_v43 }
 0x1ae   : > { %1538 = vrcp.f32 %v986_v8  ;;  %v728_v18 = vmul.f32 %v696_v33, %v2041_v61  ;;  %v729_v5 = vmul.f32 %v697_v38, %v2043_v10  ;;  %v872_v33 = vmul.f32 %v2184_v14, %v1773_v28 }
 0x1af   : > { %1540 = vrcp.f32 %v987_v2  ;;  %v2310_v11 = vadd.f32 %v2199_v56, %v798_v35  ;;  %v2323_v14 = vadd.f32 %v2236_v36, %v2186_v50  ;;  %v2326_v56 = vadd.f32 %v888_v9, %v2212_v53 }
 0x1b0   : > { %vm736_vm9 = vcmp.ge.f32.partialorder %v728_v18, 0.0  ;;  %vm737_vm0 = vcmp.ge.f32.partialorder %v729_v5, 0.0  ;;  %v932_v18 = vmul.f32 %v924_v21, %v2217_v3  ;;  %v880_v22 = vadd.f32 %v872_v33, %v848_v20 }
 0x1b1   : > { %vm2287_vm14 = vmand %vm2074_vm15, %vm736_vm9  ;;  %v926_v41 = vmul.f32 %v2102_v34, %v2310_v11  ;;  %v957_v5 = vadd.f32 %v948_v16, %v933_v23  ;;  %v928_v36 = vmul.f32 %v916_v45, %v2323_v14  ;;  %v929_v9 = vmul.f32 %v916_v45, %v2239_v49 }
 0x1b2   : > { %vm2293_vm3 = vmand %vm2081_vm1, %vm737_vm0  ;;  %v960_v2 = vpop.permute.xlu1 %959  ;;  %v956_v46 = vadd.f32 %v948_v16, %v932_v18  ;;  %v951_v16 = vadd.f32 %v2241_v55, %v927_v40  ;;  %v2341_v35 = vadd.f32 %v2208_v60, %v880_v22 }
 0x1b3   : > { %v974_v21 = vmul.f32 %v960_v2, %v2319_v58  ;;  %v950_v50 = vadd.f32 %v2241_v55, %v926_v41  ;;  %v975_v53 = vmul.f32 %v960_v2, %v2326_v56  ;;  %v952_v33 = vadd.f32 %v2122_v57, %v928_v36 }
 0x1b4   : > { %v1539_v10 = vpop.eup %1538  ;;  %v953_v2 = vadd.f32 %v2122_v57, %v929_v9  ;;  %v976_v26 = vmul.f32 %v2267_v17, %v2341_v35  ;;  %v669_v57 = vmul.f32 %v2269_v39, %v1778_v30  ;;  %v2657_v36 = vmov 0 }
 0x1b5   : > { %v1541_v38 = vpop.eup %1540  ;;  %v2307_v4 = vsel %vm2164_vm13, %v1539_v10, 1000000.0  ;;  %v982_v25 = vadd.f32 %v974_v21, %v950_v50  ;;  %v983_v34 = vadd.f32 %v975_v53, %v951_v16 }
 0x1b6   : > { %v2315_v8 = vsel %vm2170_vm12, %v1541_v38, 1000000.0  ;;  %v2344_v38 = vadd.f32 %v2208_v60, %v881_v48  ;;  %v984_v23 = vadd.f32 %v976_v26, %v952_v33  ;;  %v668_v48 = vmul.f32 %v2269_v39, %v1773_v28 }
 0x1b7   : > { %1542 = vrcp.f32 %v982_v25 }
 0x1b8   : > { %v977_v45 = vmul.f32 %v2267_v17, %v2344_v38  ;;  %1544 = vrcp.f32 %v983_v34  ;;  %v644_v17 = vmul.f32 %v2015_v44, %v1770_v27 }
 0x1b9   : > { %1546 = vrcp.f32 %v984_v23 }
 0x1ba   : > { %v972_v37 = vpop.permute.xlu1 %971  ;;  %v985_v22 = vadd.f32 %v977_v45, %v953_v2 }
 0x1bb   : > { %v980_v1 = vmul.f32 %v972_v37, %v2224_v12  ;;  %v981_v13 = vmul.f32 %v972_v37, %v2226_v59 }
 0x1bc   : > { %1548 = vrcp.f32 %v985_v22 }
 0x1bd   : > { %v988_v10 = vadd.f32 %v980_v1, %v956_v46  ;;  %v989_v20 = vadd.f32 %v981_v13, %v957_v5 }
 0x1bf   : > { %1550 = vrcp.f32 %v988_v10 }
 0x1c0   : > { %1552 = vrcp.f32 %v989_v20 }
 0x1c3   : > { %v680_v55 = vpop.permute.xlu1 %679 }
 0x1c4   : > { %v694_v18 = vadd.f32 %v680_v55, %v2131_v63  ;;  %v695_v60 = vadd.f32 %v680_v55, %v2133_v54  ;;  %v645_v63 = vmul.f32 %v2015_v44, %v1775_v29  ;;  %v1543_v54 = vpop.eup %1542  ;;  %v676_v29 = vadd.f32 %v668_v48, %v644_v17 }
 0x1c5   : > { %v1545_v30 = vpop.eup %1544  ;;  %v2662_v17 = vlaneseq }
 0x1c6   : > { %v726_v41 = vmul.f32 %v694_v18, %v2001_v31  ;;  %v727_v46 = vmul.f32 %v695_v60, %v2003_v32  ;;  %v677_v32 = vadd.f32 %v669_v57, %v645_v63  ;;  %v1547_v13 = vpop.eup %1546 }
 0x1c7   : > { %v1549_v40 = vpop.eup %1548  ;;  %v1000_v10 = vsel %vm2287_vm14, %v1547_v13, 1000000.0  ;;  %v2405_v63 = vshrl.u32 %v2662_v17, 7  ;;  %v1131_v17 = vld [vmem:[%s1700_s15] sm:$0x7] }
 0x1c8   : > { %vm734_vm15 = vcmp.ge.f32.partialorder %v726_v41, 0.0  ;;  %vm735_vm1 = vcmp.ge.f32.partialorder %v727_v46, 0.0  ;;  %v1551_v50 = vpop.eup %1550  ;;  %v1001_v16 = vsel %vm2293_vm3, %v1549_v40, 1000000.0 }
 0x1c9   : > { %vm2366_vm10 = vmand %vm2019_vm11, %vm734_vm15  ;;  %v1553_v9 = vpop.eup %1552 }
 0x1ca   : > { %vm2372_vm2 = vmand %vm2025_vm4, %vm735_vm1  ;;  %v998_v27 = vsel %vm2366_vm10, %v1543_v54, 1000000.0 }
 0x1cb   : > { %v999_v44 = vsel %vm2372_vm2, %v1545_v30, 1000000.0  ;;  %v1006_v15 = vmin.f32 %v998_v27, %v2307_v4  ;;  %v692_v39 = vpop.permute.xlu1 %691 }
 0x1cc   : > { %v1015_v37 = vmin.f32 %v999_v44, %v2315_v8  ;;  %v700_v6 = vadd.f32 %v692_v39, %v676_v29  ;;  %v701_v5 = vadd.f32 %v692_v39, %v677_v32  ;;  %v1178_v29 = vld [vmem:[#allocation2] sm:$0x3]  ;;  %v2412_v32 = vadd.s32 8, %v2405_v63 }
 0x1cd   : > { %v2422_v39 = vadd.s32 24, %v2405_v63 }
 0x1ce   : > { %v732_v21 = vmul.f32 %v700_v6, %v2086_v42  ;;  %v733_v1 = vmul.f32 %v701_v5, %v2089_v47  ;;  %v2660_v42 = vmov 0 }
 0x1d0   : > { %vm740_vm11 = vcmp.ge.f32.partialorder %v732_v21, 0.0  ;;  %vm741_vm4 = vcmp.ge.f32.partialorder %v733_v1, 0.0 }
 0x1d1   : > { %vm2386_vm7 = vmand %vm2106_vm5, %vm740_vm11 }
 0x1d2   : > { %v2658_v36 = vsel %vm2386_vm7, 4294967295, %v2657_v36  ;;  %vm2394_vm8 = vmand %vm2114_vm6, %vm741_vm4  ;;  %v1004_v47 = vsel %vm2386_vm7, %v1551_v50, 1000000.0 }
 0x1d3   : > { %v2661_v42 = vsel %vm2394_vm8, 4294967295, %v2660_v42  ;;  %v1005_v25 = vsel %vm2394_vm8, %v1553_v9, 1000000.0  ;;  %v1007_v34 = vmin.f32 %v1000_v10, %v1004_v47 }
 0x1d4   : > { %v1016_v33 = vmin.f32 %v1001_v16, %v1005_v25 }
 0x1d5   : > { %v1008_v2 = vmin.f32 %v1006_v15, %v1007_v34  ;;  %v2415_v15 = vadd.s32 16, %v2405_v63 }
 0x1d6   : > { %v1017_v26 = vmin.f32 %v1015_v37, %v1016_v33  ;;  %v1180_v37 = vperm.slane %v1178_v29, 0  ;;  %v2670_v33 = vld [vmem:[#allocation8_spill] sm:$0xff] }
 0x1d7   : > { %v1009_v45 = vrot.slane %v1008_v2, 4 }
 0x1d8   : > { %v1018_v55 = vrot.slane %v1017_v26, 4 }
 0x1d9   : > { %v1010_v18 = vmin.f32 %v1008_v2, %v1009_v45 }
 0x1da   : > { %v1019_v60 = vmin.f32 %v1017_v26, %v1018_v55 }
 0x1db   : > { %v1011_v23 = vrot.slane %v1010_v18, 2 }
 0x1dc   : > { %v1020_v22 = vrot.slane %v1019_v60, 2 }
 0x1dd   : > { %v1012_v48 = vmin.f32 %v1010_v18, %v1011_v23 }
 0x1de   : > { %v1021_v57 = vmin.f32 %v1019_v60, %v1020_v22 }
 0x1df   : > { %v1013_v41 = vrot.slane %v1012_v48, 1 }
 0x1e0   : > { %v1022_v46 = vrot.slane %v1021_v57, 1 }
 0x1e1   : > { %v1014_v54 = vmin.f32 %v1012_v48, %v1013_v41  ;;  %v1092_v41 = vsub.f32 1.0, %v2202_v43 }
 0x1e2   : > { %v1023_v30 = vmin.f32 %v1021_v57, %v1022_v46  ;;  %v2672_v57 = vld [vmem:[#allocation13_spill] sm:$0xff] }
 0x1e3   : > { %vm1029_vm5 = vcmp.eq.f32.partialorder %v998_v27, %v1014_v54  ;;  %vm1031_vm6 = vcmp.eq.f32.partialorder %v1000_v10, %v1014_v54  ;;  %vm1033_vm9 = vcmp.eq.f32.partialorder %v2307_v4, %v1014_v54  ;;  %v1210_v27 = vld [vmem:[#allocation2] sm:$0x3] }
 0x1e4   : > { %vm1030_vm15 = vcmp.eq.f32.partialorder %v999_v44, %v1023_v30  ;;  %vm1032_vm1 = vcmp.eq.f32.partialorder %v1001_v16, %v1023_v30  ;;  %vm1034_vm11 = vcmp.eq.f32.partialorder %v2315_v8, %v1023_v30  ;;  %vm1036_vm4 = vcmp.eq.f32.partialorder %v1005_v25, %v1023_v30  ;;  %vm1037_vm8 = vmand %vm2366_vm10, %vm1029_vm5 }
 0x1e5   : > { %vm1038_vm7 = vmand %vm2372_vm2, %vm1030_vm15  ;;  %v1181_v44 = vperm.slane %v1178_v29, 1  ;;  %v1045_v28 = vsel %vm1037_vm8, %v2405_v63, 4294967295  ;;  %v1213_v6 = vperm.slane %v1210_v27, 1  ;;  %vm1177_vm2 = vcmp.lt.f32.partialorder %v1023_v30, 1000000.0 }
 0x1e6   : > { %vm1039_vm0 = vmand %vm2287_vm14, %vm1031_vm6  ;;  %v1046_v31 = vsel %vm1038_vm7, %v2405_v63, 4294967295  ;;  %vm2663_vm8 = vcmp.eq.f32.partialorder %v1004_v47, %v1014_v54  ;;  %vm2664_vm6 = vnez %v2658_v36  ;;  %v1212_v13 = vperm.slane %v1210_v27, 0 }
 0x1e7   : > { %vm1040_vm10 = vmand %vm2293_vm3, %vm1032_vm1  ;;  %v1047_v19 = vsel %vm1039_vm0, %v2412_v32, 4294967295  ;;  %vm1176_vm3 = vcmp.lt.f32.partialorder %v1014_v54, 1000000.0  ;;  %vm1185_vm7 = vcmp.le.f32.partialorder %v1023_v30, %v1181_v44  ;;  %vm1184_vm1 = vcmp.le.f32.partialorder %v1014_v54, %v1180_v37 }
 0x1e8   : > { %vm1041_vm5 = vmand %vm2164_vm13, %vm1033_vm9  ;;  %v1048_v62 = vsel %vm1040_vm10, %v2412_v32, 4294967295  ;;  %vm2665_vm9 = vnez %v2661_v42 }
 0x1e9   : > { %vm1042_vm14 = vmand %vm2170_vm12, %vm1034_vm11  ;;  %v1049_v61 = vsel %vm1041_vm5, %v2415_v15, 4294967295 }
 0x1ea   : > { %vm1043_vm15 = vmand %vm2664_vm6, %vm2663_vm8  ;;  %v1050_v4 = vsel %vm1042_vm14, %v2415_v15, 4294967295  ;;  %vm1053_vm13 = vcmp.gt.s32.totalorder %v1045_v28, %v1049_v61  ;;  %vm1221_vm6 = vcmask 1040384  }
 0x1eb   : > { %vm1044_vm12 = vmand %vm2665_vm9, %vm1036_vm4  ;;  %v1051_v52 = vsel %vm1043_vm15, %v2422_v39, 4294967295  ;;  %v1054_v8 = vsel %vm1053_vm13, %v1045_v28, %v1049_v61  ;;  %vm1068_vm0 = vcmp.gt.s32.totalorder %v1046_v31, %v1050_v4  ;;  %vm2671_vm15 = vnez %v2670_v33 }
 0x1ec   : > { %v1052_v5 = vsel %vm1044_vm12, %v2422_v39, 4294967295  ;;  %vm1055_vm11 = vcmp.gt.s32.totalorder %v1047_v19, %v1051_v52  ;;  %v1069_v21 = vsel %vm1068_vm0, %v1046_v31, %v1050_v4  ;;  %vm2449_vm10 = vmand %vm1177_vm2, %vm1185_vm7 }
 0x1ed   : > { %v1056_v1 = vsel %vm1055_vm11, %v1047_v19, %v1051_v52  ;;  %vm1070_vm5 = vcmp.gt.s32.totalorder %v1048_v62, %v1052_v5  ;;  %vm2454_vm4 = vmand %vm1176_vm3, %vm1184_vm1  ;;  %v1217_v9 = vsel %vm2449_vm10, %v1023_v30, %v1213_v6 }
 0x1ee   : > { %vm1057_vm14 = vcmp.gt.s32.totalorder %v1054_v8, %v1056_v1  ;;  %v1071_v50 = vsel %vm1070_vm5, %v1048_v62, %v1052_v5  ;;  %v1220_v42 = vrot.slane %v1217_v9, 7  ;;  %v1216_v16 = vsel %vm2454_vm4, %v1014_v54, %v1212_v13 }
 0x1ef   : > { %v1058_v36 = vsel %vm1057_vm14, %v1054_v8, %v1056_v1  ;;  %vm1072_vm8 = vcmp.gt.s32.totalorder %v1069_v21, %v1071_v50 }
 0x1f0   : > { %v1059_v10 = vrot.slane %v1058_v36, 4  ;;  %v1073_v20 = vsel %vm1072_vm8, %v1069_v21, %v1071_v50  ;;  %v1222_v25 = vsel %vm1221_vm6, %v1216_v16, %v1220_v42 }
 0x1f1   : > { %v1074_v47 = vrot.slane %v1073_v20, 4  ;;  %1228 = vst.msk [vmem:[#allocation2] sm:$0x3] %vm2671_vm15, %v1222_v25 }
 0x1f2   : > { %vm1060_vm2 = vcmp.gt.s32.totalorder %v1058_v36, %v1059_v10 }
 0x1f3   : > { %v1061_v34 = vsel %vm1060_vm2, %v1058_v36, %v1059_v10  ;;  %vm1075_vm3 = vcmp.gt.s32.totalorder %v1073_v20, %v1074_v47 }
 0x1f4   : > { %v1062_v2 = vrot.slane %v1061_v34, 2  ;;  %v1076_v26 = vsel %vm1075_vm3, %v1073_v20, %v1074_v47  ;;  %vm1132_vm3 = vcmask 785408  }
 0x1f5   : > { %v1077_v45 = vrot.slane %v1076_v26, 2 }
 0x1f6   : > { %vm1063_vm13 = vcmp.gt.s32.totalorder %v1061_v34, %v1062_v2 }
 0x1f7   : > { %v1064_v55 = vsel %vm1063_vm13, %v1061_v34, %v1062_v2  ;;  %vm1078_vm7 = vcmp.gt.s32.totalorder %v1076_v26, %v1077_v45  ;;  %vm1206_vm13 = vcmask 1043456  }
 0x1f8   : > { %v1065_v18 = vrot.slane %v1064_v55, 1  ;;  %v1079_v60 = vsel %vm1078_vm7, %v1076_v26, %v1077_v45 }
 0x1f9   : > { %v1080_v23 = vrot.slane %v1079_v60, 1 }
 0x1fa   : > { %vm1066_vm9 = vcmp.gt.s32.totalorder %v1064_v55, %v1065_v18 }
 0x1fb   : > { %v1067_v22 = vsel %vm1066_vm9, %v1064_v55, %v1065_v18  ;;  %vm1081_vm12 = vcmp.gt.s32.totalorder %v1079_v60, %v1080_v23 }
 0x1fc   : > { %vm1089_vm0 = vcmp.eq.s32.totalorder %v2422_v39, %v1067_v22  ;;  %v1082_v48 = vsel %vm1081_vm12, %v1079_v60, %v1080_v23  ;;  %vm1087_vm11 = vcmp.eq.s32.totalorder %v2415_v15, %v1067_v22  ;;  %vm1085_vm14 = vcmp.eq.s32.totalorder %v2412_v32, %v1067_v22 }
 0x1fd   : > { %1394 = vmatpush.msk.msra.mxu0 %vm1089_vm0, %v2217_v3  ;;  %vm1090_vm1 = vcmp.eq.s32.totalorder %v2422_v39, %v1082_v48  ;;  %vm1088_vm5 = vcmp.eq.s32.totalorder %v2415_v15, %v1082_v48  ;;  %vm1086_vm8 = vcmp.eq.s32.totalorder %v2412_v32, %v1082_v48  ;;  %vm1083_vm6 = vcmp.eq.s32.totalorder %v2405_v63, %v1067_v22 }
 0x1fe   : > { %1407 = vmatpush.msk.msra.mxu1 %vm1090_vm1, %v2220_v51  ;;  %vm1084_vm2 = vcmp.eq.s32.totalorder %v2405_v63, %v1082_v48  ;;  %v1093_v3 = vsub.f32 1.0, %v2323_v14  ;;  %v2674_v51 = vld [vmem:[#allocation12_spill] sm:$0xff] }
 0x1ff   : > { %1395 = vmatpush.msk.msra.mxu0 %vm1087_vm11, %v2672_v57 }
 0x200   : > { %1408 = vmatpush.msk.msra.mxu1 %vm1088_vm5, %v2253_v24  ;;  %v1091_v24 = vsub.f32 1.0, %v2310_v11 }
 0x201   : > { %1396 = vmatpush.msk.msra.mxu0 %vm1085_vm14, %v2323_v14  ;;  %v2676_v14 = vld [vmem:[#allocation15_spill] sm:$0xff] }
 0x202   : > { %1409 = vmatpush.msk.msra.mxu1 %vm1086_vm8, %v2239_v49  ;;  %v1099_v46 = vsub.f32 %v1091_v24, %v2319_v58 }
 0x203   : > { %1397 = vmatpush.msk.msra.mxu0 %vm1083_vm6, %v2310_v11  ;;  %v1100_v11 = vsub.f32 %v1092_v41, %v2326_v56 }
 0x204   : > { %1410 = vmatpush.msk.msra.mxu1 %vm1084_vm2, %v2202_v43  ;;  %v1188_v43 = vld [vmem:[#allocation3] sm:$0x77] }
 0x205   : > { %1398 = vmatpush.msk.msra.mxu0 %vm1089_vm0, %v2224_v12  ;;  %v2675_v12 = vld [vmem:[#allocation14_spill] sm:$0xff]  ;;  %1196 = vst [vmem:[#allocation1] ss:$2 sm:$0xff] %v1188_v43 }
 0x206   : > { %1411 = vmatpush.msk.msra.mxu1 %vm1090_vm1, %v2226_v59  ;;  %v1101_v59 = vsub.f32 %v1093_v3, %v2341_v35 }
 0x207   : > { %1399 = vmatpush.msk.msra.mxu0 %vm1087_vm11, %v2255_v7  ;;  %v2673_v7 = vld [vmem:[#allocation11_spill] sm:$0xff] }
 0x208   : > { %1412 = vmatpush.msk.msra.mxu1 %vm1088_vm5, %v2257_v0  ;;  %v1094_v0 = vsub.f32 1.0, %v2239_v49 }
 0x209   : > { %1400 = vmatpush.msk.msra.mxu0 %vm1085_vm14, %v2341_v35  ;;  %v2677_v35 = vmov 0  }
 0x20a   : > { %1413 = vmatpush.msk.msra.mxu1 %vm1086_vm8, %v2344_v38  ;;  %v1102_v49 = vsub.f32 %v1094_v0, %v2344_v38  ;;  %v1189_v38 = vsel %vm2454_vm4, 1, %v2677_v35 }
 0x20b   : > { %1401 = vmatpush.msk.msra.mxu0 %vm1083_vm6, %v2319_v58  ;;  %v1190_v58 = vsel %vm2449_vm10, 1, %v2677_v35 }
 0x20c   : > { %1414 = vmatpush.msk.msra.mxu1 %vm1084_vm2, %v2326_v56  ;;  %v1192_v54 = vperm.slane %v1190_v58, 0  ;;  %v1191_v56 = vperm.slane %v1189_v38, 0  ;;  %v1198_v30 = vld.sshfl [vmem:[#allocation1 + $0x8] sm:$0xff pattern:$0x75316420] }
 0x20d   : > { %1402 = vmatpush.msk.msra.mxu0 %vm1089_vm0, %v2673_v7  ;;  %v1197_v32 = vld.sshfl [vmem:[#allocation1] sm:$0xff pattern:$0x75316420] }
 0x20e   : > { %1415 = vmatpush.msk.msra.mxu1 %vm1090_vm1, %v2674_v51  ;;  %vm1194_vm15 = vcmp.eq.s32.totalorder %v1192_v54, 1  ;;  %vm1193_vm7 = vcmp.eq.s32.totalorder %v1191_v56, 1 }
 0x20f   : > { %1403 = vmatpush.msk.msra.mxu0 %vm1087_vm11, %v2675_v12 }
 0x210   : > { %1416 = vmatpush.msk.msra.mxu1 %vm1088_vm5, %v2676_v14 }
 0x211   : > { %1404 = vmatpush.msk.msra.mxu0 %vm1085_vm14, %v1101_v59 }
 0x212   : > { %1417 = vmatpush.msk.msra.mxu1 %vm1086_vm8, %v1102_v49 }
 0x213   : > { %1405 = vmatpush.msk.msra.mxu0 %vm1083_vm6, %v1099_v46 }
 0x214   : > { %1418 = vmatpush.msk.msra.mxu1 %vm1084_vm2, %v1100_v11  ;;  %1406 = vmatmul.msk.f32.vlgmr.msra.gmra.mxu0 %vm1132_vm3, %v1131_v17 }
 0x215   : > { %1419 = vmatmul.msk.f32.vlgmr.msra.gmra.mxu1 %vm1132_vm3, %v1131_v17 }
 0x291   : > { %v1153_v29 = vpop.f32.mrf.mxu0 }
 0x292   : > { %v1173_v15 = vpop.f32.mrf.mxu1  ;;  %v1201_v44 = vsel %vm1193_vm7, %v1153_v29, %v1197_v32 }
 0x293   : > { %v1202_v63 = vsel %vm1194_vm15, %v1173_v15, %v1198_v30 }
 0x294   : > { %v1205_v27 = vrot.slane %v1202_v63, 4 }
 0x296   : > { %v1207_v39 = vsel %vm1206_vm13, %v1201_v44, %v1205_v27 }
 0x297   : > { %1209 = vst [vmem:[#allocation3] sm:$0x77] %v1207_v39 }
 0x298 PF: > { %v1232_v37 = vld [vmem:[#allocation2] sm:$0x3]  ;;  %v2678_v31 = vmov 0.0   ;;  %vm1248_vm4 = vcmask 1042432   ;;  %vm1254_vm9 = vcmask 1043456  }
 0x299   : > { %vm1233_vm10 = vcmp.lt.f32.partialorder %v1232_v37, 1000000.0 }
 0x29a   : > { %v1420_v6 = vsel %vm1233_vm10, 1.0, %v2678_v31 }
 0x29b   : > { %v1245_v19 = vperm.slane %v1420_v6, 1  ;;  %v1244_v61 = vperm.slane %v1420_v6, 0 }
 0x29e   : > { %v1236_v28 = vld [vmem:[#allocation3] sm:$0x77] }
 0x29f   : > { %1238 = vst [vmem:[#allocation1] ss:$2 sm:$0xff] %v1236_v28 }
 0x2a6   : > { %v1239_v62 = vld.sshfl [vmem:[#allocation1] sm:$0xff pattern:$0x75316420]  ;;  %v1240_v4 = vld.sshfl [vmem:[#allocation1 + $0x8] sm:$0xff pattern:$0x75316420] }
 0x2a7   : > { %v1250_v52 = vsel %vm1248_vm4, %v1240_v4, %v1245_v19  ;;  %v1249_v5 = vsel %vm1248_vm4, %v1239_v62, %v1244_v61 }
 0x2a8   : > { %v1253_v8 = vrot.slane %v1250_v52, 4 }
 0x2aa   : > { %v1255_v21 = vsel %vm1254_vm9, %v1249_v5, %v1253_v8 }
 0x2ab   : > { %1257 = vst [vmem:[%s1705_s20] sm:$0xff] %v1255_v21 }
 0x2ac PF: > { %s28_s28 = sadd.s32 1, %s1602_s28   ;;  %s2679_s26 = smov %s1598_s27 }
 0x2ad   : > { %p25_p0 = scmp.ge.s32.totalorder %s28_s28, 4   ;;  %s2680_s27 = smov %s2682_s0 }
 0x2af   :  { %27 = sbr.rel (!%p25_p0) target bundleno = 9 (0x9), region = 81 }

</bundles_post_ra>
